<compile_context>
chip_gen: v6e
topology: v6e:2x2x1
jax: 0.10.0
libtpu: 0.0.40
codegen_flags: <defaults>
</compile_context>

<pallas_src>
import functools
import inspect

import jax
import jax.numpy as jnp
from jax.experimental import pallas as pl
from jax.experimental.pallas import tpu as pltpu


# ------------------------------------------------------------------ utilities

def _round_up(x, m):
    return (x + m - 1) // m * m


def _pad_to(a, shape):
    pads = [(0, t - s) for s, t in zip(a.shape, shape)]
    if all(p == (0, 0) for p in pads):
        return a
    return jnp.pad(a, pads)


def _tpu_vmem_and_cores():
    """Best-effort chip query; conservative (v7x-class) fallback."""
    vmem, cores = None, 1
    get_info = getattr(pltpu, "get_tpu_info", None)
    if get_info is not None:
        try:
            info = get_info()
            vmem = getattr(info, "vmem_capacity_bytes", None)
            for attr in ("num_cores", "num_tensorcores", "tensor_cores_per_chip",
                         "cores_per_chip"):
                v = getattr(info, attr, None)
                if isinstance(v, int) and v > 0:
                    cores = v
                    break
        except Exception:
            pass
    if not vmem:
        vmem = 64 * 1024 * 1024
    return int(vmem), int(cores)


def _supports_single_buffer():
    if not hasattr(pl, "Buffered"):
        return False
    try:
        return "pipeline_mode" in inspect.signature(pl.BlockSpec).parameters
    except (TypeError, ValueError):
        return False


def _pick_batch_tile(B, Sp, footprint_fn, budget, n_cores, target_rows=1024):
    divisors = [t for t in range(1, B + 1) if B % t == 0]
    row_cap = max(target_rows, Sp)
    feasible = [t for t in divisors if t * Sp <= row_cap and footprint_fn(t) <= budget]
    if not feasible:
        return 1
    if n_cores >= 2:
        pref = [t for t in feasible if (B // t) % n_cores == 0]
        if pref:
            return max(pref)
    return max(feasible)


def _layer_norm(y, g, b, eps, d_real, mask):
    """LayerNorm over the last dim; `mask` handles lane padding (padded cols of y are 0)."""
    if mask is None:
        mu = jnp.mean(y, axis=-1, keepdims=True)
        yc = y - mu
        var = jnp.mean(yc * yc, axis=-1, keepdims=True)
    else:
        inv_d = 1.0 / float(d_real)
        mu = jnp.sum(y, axis=-1, keepdims=True) * inv_d      # padded cols are exactly 0
        yc = jnp.where(mask, y - mu, 0.0)
        var = jnp.sum(yc * yc, axis=-1, keepdims=True) * inv_d
    return yc * jax.lax.rsqrt(var + eps) * g + b


# --------------------------------------------------------------------- kernel

def att_kernel(x_ref,
               wqkv_ref, bqkv_ref, wo_ref, bo_ref,
               g1_ref, be1_ref,
               w1_ref, b1_ref, w2_ref, b2_ref,
               g2_ref, be2_ref,
               out_ref,
               *, n_head, dqp, dkp, dvp, d_real, s_real, eps, compute_dtype):
    TB, Sp, Dp = x_ref.shape
    R = TB * Sp
    H = n_head
    cdt = compute_dtype
    use_approx_recip = jnp.dtype(cdt) != jnp.dtype(jnp.float32)

    x = x_ref[...].reshape(R, Dp)            # f32 activation slab
    xc = x.astype(cdt)

    # Feature-lane padding mask for LayerNorm.
    if Dp != d_real:
        col = jax.lax.broadcasted_iota(jnp.int32, (1, Dp), 1)
        feat_mask = col < d_real
    else:
        feat_mask = None

    # Key-position mask for sequence padding.
    if Sp != s_real:
        kcol = jax.lax.broadcasted_iota(jnp.int32, (1, 1, Sp), 2)
        key_mask = kcol < s_real
    else:
        key_mask = None

    # ---- fused Q/K/V projection: one wide matmul (scale already folded into Wq/bq) ----
    qkv = jnp.dot(xc, wqkv_ref[...], preferred_element_type=jnp.float32) + bqkv_ref[...]
    q_off = 0
    k_off = H * dqp
    v_off = H * dqp + H * dkp

    # ---- per-head attention core (128-lane-aligned slices, batched einsums) ----
    ctx_list = []
    for h in range(H):                        # static, small
        qh = qkv[:, q_off + h * dqp: q_off + (h + 1) * dqp].reshape(TB, Sp, dqp).astype(cdt)
        kh = qkv[:, k_off + h * dkp: k_off + (h + 1) * dkp].reshape(TB, Sp, dkp).astype(cdt)
        vh = qkv[:, v_off + h * dvp: v_off + (h + 1) * dvp].reshape(TB, Sp, dvp).astype(cdt)

        # Contract last dims directly (no explicit transpose).
        s = jnp.einsum('bik,bjk->bij', qh, kh, preferred_element_type=jnp.float32)
        if key_mask is not None:
            s = jnp.where(key_mask, s, -1e30)
        s = s - jnp.max(s, axis=-1, keepdims=True)
        e = jnp.exp(s)
        denom = jnp.sum(e, axis=-1, keepdims=True)
        if use_approx_recip:
            p = e * pl.reciprocal(denom, approx=True)
        else:
            p = e / denom

        ctx = jnp.einsum('bij,bjd->bid', p.astype(cdt), vh,
                         preferred_element_type=jnp.float32)
        ctx_list.append(ctx.reshape(R, dvp))

    ctx_all = ctx_list[0] if H == 1 else jnp.concatenate(ctx_list, axis=-1)

    # ---- single fused output projection over all heads ----
    o = jnp.dot(ctx_all.astype(cdt), wo_ref[...],
                preferred_element_type=jnp.float32) + bo_ref[...]

    # residual + LayerNorm (MultiHeadATT)
    h1 = _layer_norm(o + x, g1_ref[...], be1_ref[...], eps, d_real, feat_mask)

    # position-wise FFN + residual + LayerNorm (ATT)
    f = jnp.dot(h1.astype(cdt), w1_ref[...],
                preferred_element_type=jnp.float32) + b1_ref[...]
    f = jnp.maximum(f, 0.0)
    f2 = jnp.dot(f.astype(cdt), w2_ref[...],
                 preferred_element_type=jnp.float32) + b2_ref[...]
    y = _layer_norm(f2 + h1, g2_ref[...], be2_ref[...], eps, d_real, feat_mask)

    out_ref[...] = y.reshape(TB, Sp, Dp).astype(out_ref.dtype)


# -------------------------------------------------------------------- wrapper

def init_params(key, d_model, d_k=64, d_q=64, d_v=64, n_head=1):
    ks = jax.random.split(key, 12)
    std = 0.02
    rnd = lambda k, shape: jax.random.normal(k, shape, jnp.float32) * std
    return {
        "wq": rnd(ks[0], (d_model, d_q * n_head)),
        "bq": rnd(ks[1], (1, d_q * n_head)),
        "wk": rnd(ks[2], (d_model, d_k * n_head)),
        "bk": rnd(ks[3], (1, d_k * n_head)),
        "wv": rnd(ks[4], (d_model, d_v * n_head)),
        "bv": rnd(ks[5], (1, d_v * n_head)),
        "wo": rnd(ks[6], (d_v * n_head, d_model)),
        "bo": rnd(ks[7], (1, d_model)),
        "g1": jnp.ones((1, d_model), jnp.float32),
        "be1": jnp.zeros((1, d_model), jnp.float32),
        "w1": rnd(ks[8], (d_model, 2 * d_model)),
        "b1": rnd(ks[9], (1, 2 * d_model)),
        "w2": rnd(ks[10], (2 * d_model, d_model)),
        "b2": rnd(ks[11], (1, d_model)),
        "g2": jnp.ones((1, d_model), jnp.float32),
        "be2": jnp.zeros((1, d_model), jnp.float32),
    }


def att_forward(patchs, params, *, n_head=1, d_q=64, d_k=64, d_v=64,
                eps=1e-5, compute_dtype=jnp.bfloat16):
    assert d_q == d_k, "scaled-dot-product attention requires d_q == d_k"
    B, S, D = patchs.shape
    H = n_head
    Dp = _round_up(D, 128)                  # lane-dense model dim
    Fp = _round_up(2 * D, 128)              # lane-dense FFN hidden dim
    Sp = _round_up(S, 8)                    # sublane-clean sequence dim
    dqp = _round_up(d_q, 128)               # per-head segment widths (lane-aligned slices)
    dkp = _round_up(d_k, 128)
    dvp = _round_up(d_v, 128)
    Wtot = H * (dqp + dkp + dvp)
    cdt = compute_dtype

    # ---- parameter prep (layout + padding + dtype) done once, outside the kernel ----
    x_p = _pad_to(patchs.astype(jnp.float32), (B, Sp, Dp))

    def pack_heads(w, b, d, dp):
        # w: (D, H*d) head-major columns; b: (1, H*d)  ->  (Dp, H*dp), (1, H*dp)
        w = w.reshape(D, H, d)
        w = jnp.pad(w, ((0, Dp - D), (0, 0), (0, dp - d))).reshape(Dp, H * dp)
        b = b.reshape(H, d)
        b = jnp.pad(b, ((0, 0), (0, dp - d))).reshape(1, H * dp)
        return w, b

    # PyTorch quirk: scale = 1/sqrt(len(q[0])) = 1/sqrt(n_head); fold into Wq/bq.
    scale = 1.0 / (float(n_head) ** 0.5)
    wq_p, bq_p = pack_heads(params["wq"] * scale, params["bq"] * scale, d_q, dqp)
    wk_p, bk_p = pack_heads(params["wk"], params["bk"], d_k, dkp)
    wv_p, bv_p = pack_heads(params["wv"], params["bv"], d_v, dvp)
    wqkv = jnp.concatenate([wq_p, wk_p, wv_p], axis=1).astype(cdt)      # (Dp, Wtot)
    bqkv = jnp.concatenate([bq_p, bk_p, bv_p], axis=1).astype(jnp.float32)

    wo = params["wo"].reshape(H, d_v, D)
    wo = jnp.pad(wo, ((0, 0), (0, dvp - d_v), (0, Dp - D))).reshape(H * dvp, Dp).astype(cdt)
    bo = _pad_to(params["bo"].astype(jnp.float32), (1, Dp))
    g1 = _pad_to(params["g1"].astype(jnp.float32), (1, Dp))
    be1 = _pad_to(params["be1"].astype(jnp.float32), (1, Dp))
    w1 = _pad_to(params["w1"], (Dp, Fp)).astype(cdt)
    b1 = _pad_to(params["b1"].astype(jnp.float32), (1, Fp))
    w2 = _pad_to(params["w2"], (Fp, Dp)).astype(cdt)
    b2 = _pad_to(params["b2"].astype(jnp.float32), (1, Dp))
    g2 = _pad_to(params["g2"].astype(jnp.float32), (1, Dp))
    be2 = _pad_to(params["be2"].astype(jnp.float32), (1, Dp))

    plist = [wqkv, bqkv, wo, bo, g1, be1, w1, b1, w2, b2, g2, be2]

    # ---- per-chip VMEM budget & batch-tile selection ----
    vmem_cap, n_cores = _tpu_vmem_and_cores()
    vmem_limit = min(int(vmem_cap * 0.85), 112 * 1024 * 1024)
    budget = int(vmem_limit * 0.7)
    weight_bytes = sum(int(p.size) * jnp.dtype(p.dtype).itemsize for p in plist)

    def footprint(tb):
        r = tb * Sp
        slabs = 4 * tb * Sp * Dp * 4                 # x + out slabs, double-buffered
        inter = (r * Wtot * 4                        # fused QKV activations
                 + 3 * tb * Sp * Sp * 4              # scores / exp / probs
                 + r * (H * dvp) * 4                 # concatenated context
                 + 2 * r * Fp * 4                    # FFN hidden
                 + 8 * r * Dp * 4)                   # o / h1 / f2 / y and casts
        return slabs + inter + 2 * weight_bytes      # conservative: weights double-buffered

    TB = _pick_batch_tile(B, Sp, footprint, budget, n_cores)

    kernel = functools.partial(att_kernel, n_head=H, dqp=dqp, dkp=dkp, dvp=dvp,
                               d_real=D, s_real=S, eps=eps, compute_dtype=cdt)
    single_buffer_ok = _supports_single_buffer()

    def const_spec(p, single_buffer):
        nd = p.ndim
        kwargs = {}
        if single_buffer:
            kwargs["pipeline_mode"] = pl.Buffered(1)   # weights never change -> 1 buffer
        return pl.BlockSpec(p.shape, lambda i, _nd=nd: (0,) * _nd, **kwargs)

    def build(single_buffer):
        in_specs = [pl.BlockSpec((TB, Sp, Dp), lambda i: (i, 0, 0))]
        in_specs += [const_spec(p, single_buffer) for p in plist]
        out_specs = pl.BlockSpec((TB, Sp, Dp), lambda i: (i, 0, 0))
        return pl.pallas_call(
            kernel,
            out_shape=jax.ShapeDtypeStruct((B, Sp, Dp), jnp.float32),
            grid_spec=pltpu.PrefetchScalarGridSpec(
                num_scalar_prefetch=0,
                grid=(B // TB,),
                in_specs=in_specs,
                out_specs=out_specs,
            ),
            compiler_params=pltpu.CompilerParams(
                dimension_semantics=("parallel",),
                vmem_limit_bytes=vmem_limit,
            ),
        )

    try:
        out = build(single_buffer_ok)(x_p, *plist)
    except Exception:
        if not single_buffer_ok:
            raise
        out = build(False)(x_p, *plist)    # fall back to default double-buffering
    return out[:, :S, :D]


# ------------------------------------------------------------------- reference

def _ln_ref(y, g, b, eps):
    mu = jnp.mean(y, axis=-1, keepdims=True)
    var = jnp.mean((y - mu) ** 2, axis=-1, keepdims=True)
    return (y - mu) * jax.lax.rsqrt(var + eps) * g + b


def att_reference(patchs, params, *, n_head=1, d_q=64, d_k=64, d_v=64,
                  eps=1e-5, compute_dtype=jnp.float32):
    """Pure-JAX reference mirroring the PyTorch forward (incl. the sqrt(n_head) quirk)."""
    cdt = compute_dtype

    def mm(a, w):
        return jnp.matmul(a.astype(cdt), w.astype(cdt),
                          preferred_element_type=jnp.float32)

    x = patchs
    q = mm(x, params["wq"]) + params["bq"]
    k = mm(x, params["wk"]) + params["bk"]
    v = mm(x, params["wv"]) + params["bv"]
    B, S, _ = x.shape
    q = q.reshape(B, S, n_head, d_q).transpose(0, 2, 1, 3)
    k = k.reshape(B, S, n_head, d_k).transpose(0, 2, 1, 3)
    v = v.reshape(B, S, n_head, d_v).transpose(0, 2, 1, 3)
    s = jnp.einsum("bhqd,bhkd->bhqk", q.astype(cdt), k.astype(cdt),
                   preferred_element_type=jnp.float32) / (float(n_head) ** 0.5)
    p = jax.nn.softmax(s, axis=-1)
    ctx = jnp.einsum("bhqk,bhkd->bhqd", p.astype(cdt), v.astype(cdt),
                     preferred_element_type=jnp.float32)
    ctx = ctx.transpose(0, 2, 1, 3).reshape(B, S, n_head * d_v)
    o = mm(ctx, params["wo"]) + params["bo"]
    h1 = _ln_ref(o + x, params["g1"], params["be1"], eps)
    f = jnp.maximum(mm(h1, params["w1"]) + params["b1"], 0.0)
    f = mm(f, params["w2"]) + params["b2"]
    return _ln_ref(f + h1, params["g2"], params["be2"], eps)


# ----------------------------------------------------------------------- main

if __name__ == "__main__":
    key = jax.random.PRNGKey(0)
    d_k = d_q = d_v = 64

    # --- Config A: module-default sizes (d_model=32, n_head=1), bf16 MXU compute.
    B, S, d_model, n_head = 2, 8, 32, 1
    kx, kp, key = jax.random.split(key, 3)
    patchs = jax.random.normal(kx, (B, S, d_model), jnp.float32)
    params = init_params(kp, d_model, d_k=d_k, d_q=d_q, d_v=d_v, n_head=n_head)

    out = att_forward(patchs, params, n_head=n_head, d_q=d_q, d_k=d_k, d_v=d_v,
                      compute_dtype=jnp.bfloat16)
    out = jax.block_until_ready(out)
    assert out.shape == (B, S, d_model)
    ref_bf16 = att_reference(patchs, params, n_head=n_head, d_q=d_q, d_k=d_k,
                             d_v=d_v, compute_dtype=jnp.bfloat16)
    ref_f32 = att_reference(patchs, params, n_head=n_head, d_q=d_q, d_k=d_k,
                            d_v=d_v, compute_dtype=jnp.float32)
    assert jnp.allclose(out, ref_bf16, atol=2e-2, rtol=2e-2), "mismatch vs bf16 ref (A)"
    assert jnp.allclose(out, ref_f32, atol=5e-2, rtol=5e-2), "mismatch vs f32 ref (A)"

    # --- Config B: lane-dense d_model=128, n_head=2, f32 compute (exact softmax path).
    B2, S2, d_model2, n_head2 = 4, 16, 128, 2
    kx, kp, key = jax.random.split(key, 3)
    patchs2 = jax.random.normal(kx, (B2, S2, d_model2), jnp.float32)
    params2 = init_params(kp, d_model2, d_k=d_k, d_q=d_q, d_v=d_v, n_head=n_head2)
    out2 = att_forward(patchs2, params2, n_head=n_head2, d_q=d_q, d_k=d_k, d_v=d_v,
                       compute_dtype=jnp.float32)
    out2 = jax.block_until_ready(out2)
    assert out2.shape == (B2, S2, d_model2)
    ref2 = att_reference(patchs2, params2, n_head=n_head2, d_q=d_q, d_k=d_k,
                         d_v=d_v, compute_dtype=jnp.float32)
    assert jnp.allclose(out2, ref2, atol=1e-2, rtol=1e-2), "mismatch vs ref (B)"

    # --- Config C: non-multiple-of-8 sequence (S=6) -> exercises seq padding + key mask.
    B3, S3, d_model3, n_head3 = 2, 6, 32, 2
    kx, kp, key = jax.random.split(key, 3)
    patchs3 = jax.random.normal(kx, (B3, S3, d_model3), jnp.float32)
    params3 = init_params(kp, d_model3, d_k=d_k, d_q=d_q, d_v=d_v, n_head=n_head3)
    out3 = att_forward(patchs3, params3, n_head=n_head3, d_q=d_q, d_k=d_k, d_v=d_v,
                       compute_dtype=jnp.float32)
    out3 = jax.block_until_ready(out3)
    assert out3.shape == (B3, S3, d_model3)
    ref3 = att_reference(patchs3, params3, n_head=n_head3, d_q=d_q, d_k=d_k,
                         d_v=d_v, compute_dtype=jnp.float32)
    assert jnp.allclose(out3, ref3, atol=1e-2, rtol=1e-2), "mismatch vs ref (C)"

    print("KERNEL_OK")
</pallas_src>

<mosaic_0001>
module attributes {stable_mosaic.version = 11 : i64} {
  func.func @att_kernel(%arg0: i32, %arg1: memref<2x8x128xf32, #tpu.memory_space<vmem>>, %arg2: memref<128x384xbf16, #tpu.memory_space<vmem>>, %arg3: memref<1x384xf32, #tpu.memory_space<vmem>>, %arg4: memref<128x128xbf16, #tpu.memory_space<vmem>>, %arg5: memref<1x128xf32, #tpu.memory_space<vmem>>, %arg6: memref<1x128xf32, #tpu.memory_space<vmem>>, %arg7: memref<1x128xf32, #tpu.memory_space<vmem>>, %arg8: memref<128x128xbf16, #tpu.memory_space<vmem>>, %arg9: memref<1x128xf32, #tpu.memory_space<vmem>>, %arg10: memref<128x128xbf16, #tpu.memory_space<vmem>>, %arg11: memref<1x128xf32, #tpu.memory_space<vmem>>, %arg12: memref<1x128xf32, #tpu.memory_space<vmem>>, %arg13: memref<1x128xf32, #tpu.memory_space<vmem>>, %arg14: memref<2x8x128xf32, #tpu.memory_space<vmem>>) attributes {dimension_semantics = [#tpu.dimension_semantics<parallel>], iteration_bounds = array<i64: 1>, scalar_prefetch = 0 : i64, scratch_operands = 0 : i64, tpu.core_type = #tpu.core_type<tc>, window_params = [{transform_indices = @transform_0, window_bounds = array<i64: 2, 8, 128>}, {pipeline_mode = #tpu.pipeline_mode<synchronous>, transform_indices = @transform_1, window_bounds = array<i64: 128, 384>}, {pipeline_mode = #tpu.pipeline_mode<synchronous>, transform_indices = @transform_2, window_bounds = array<i64: 1, 384>}, {pipeline_mode = #tpu.pipeline_mode<synchronous>, transform_indices = @transform_3, window_bounds = array<i64: 128, 128>}, {pipeline_mode = #tpu.pipeline_mode<synchronous>, transform_indices = @transform_4, window_bounds = array<i64: 1, 128>}, {pipeline_mode = #tpu.pipeline_mode<synchronous>, transform_indices = @transform_5, window_bounds = array<i64: 1, 128>}, {pipeline_mode = #tpu.pipeline_mode<synchronous>, transform_indices = @transform_6, window_bounds = array<i64: 1, 128>}, {pipeline_mode = #tpu.pipeline_mode<synchronous>, transform_indices = @transform_7, window_bounds = array<i64: 128, 128>}, {pipeline_mode = #tpu.pipeline_mode<synchronous>, transform_indices = @transform_8, window_bounds = array<i64: 1, 128>}, {pipeline_mode = #tpu.pipeline_mode<synchronous>, transform_indices = @transform_9, window_bounds = array<i64: 128, 128>}, {pipeline_mode = #tpu.pipeline_mode<synchronous>, transform_indices = @transform_10, window_bounds = array<i64: 1, 128>}, {pipeline_mode = #tpu.pipeline_mode<synchronous>, transform_indices = @transform_11, window_bounds = array<i64: 1, 128>}, {pipeline_mode = #tpu.pipeline_mode<synchronous>, transform_indices = @transform_12, window_bounds = array<i64: 1, 128>}, {transform_indices = @transform_13, window_bounds = array<i64: 2, 8, 128>}]} {
    %c0 = arith.constant 0 : index
    %c0_0 = arith.constant 0 : index
    %c0_1 = arith.constant 0 : index
    %0 = vector.load %arg1[%c0, %c0_0, %c0_1] : memref<2x8x128xf32, #tpu.memory_space<vmem>>, vector<2x8x128xf32>
    %1 = vector.shape_cast %0 : vector<2x8x128xf32> to vector<16x128xf32>
    %2 = arith.truncf %1 : vector<16x128xf32> to vector<16x128xbf16>
    %3 = tpu.iota {dimensions = array<i32: 1>} : vector<1x128xi32>
    %c32_i32 = arith.constant 32 : i32
    %4 = vector.broadcast %c32_i32 : i32 to vector<1x128xi32>
    %5 = arith.cmpi slt, %3, %4 : vector<1x128xi32>
    %c0_2 = arith.constant 0 : index
    %c0_3 = arith.constant 0 : index
    %6 = vector.load %arg2[%c0_2, %c0_3] : memref<128x384xbf16, #tpu.memory_space<vmem>>, vector<128x384xbf16>
    %cst = arith.constant dense<0.000000e+00> : vector<16x384xf32>
    %7 = tpu.matmul %2, %6, %cst {dimension_numbers = #tpu.dot_dimension_numbers<[1], [0], [0], [1], [0, 0, 1, 1], [], []>} : vector<16x128xbf16>, vector<128x384xbf16>, vector<16x384xf32> -> vector<16x384xf32>
    %c0_4 = arith.constant 0 : index
    %c0_5 = arith.constant 0 : index
    %8 = vector.load %arg3[%c0_4, %c0_5] : memref<1x384xf32, #tpu.memory_space<vmem>>, vector<1x384xf32>
    %9 = vector.broadcast %8 : vector<1x384xf32> to vector<16x384xf32>
    %10 = arith.addf %7, %9 : vector<16x384xf32>
    %11 = vector.extract_strided_slice %10 {offsets = [0, 0], sizes = [16, 128], strides = [1, 1]} : vector<16x384xf32> to vector<16x128xf32>
    %12 = vector.shape_cast %11 : vector<16x128xf32> to vector<2x8x128xf32>
    %13 = arith.truncf %12 : vector<2x8x128xf32> to vector<2x8x128xbf16>
    %14 = vector.extract_strided_slice %10 {offsets = [0, 128], sizes = [16, 128], strides = [1, 1]} : vector<16x384xf32> to vector<16x128xf32>
    %15 = vector.shape_cast %14 : vector<16x128xf32> to vector<2x8x128xf32>
    %16 = arith.truncf %15 : vector<2x8x128xf32> to vector<2x8x128xbf16>
    %17 = vector.extract_strided_slice %10 {offsets = [0, 256], sizes = [16, 128], strides = [1, 1]} : vector<16x384xf32> to vector<16x128xf32>
    %18 = vector.shape_cast %17 : vector<16x128xf32> to vector<2x8x128xf32>
    %19 = arith.truncf %18 : vector<2x8x128xf32> to vector<2x8x128xbf16>
    "tpu.trace_start"() <{level = 10 : i32, message = "bik,bjk->bij"}> : () -> ()
    %cst_6 = arith.constant dense<0.000000e+00> : vector<2x8x8xf32>
    %20 = tpu.matmul %13, %16, %cst_6 {dimension_numbers = #tpu.dot_dimension_numbers<[2], [2], [1], [1], [0, 0, 0, 1, 1, 1], [0], [0]>} : vector<2x8x128xbf16>, vector<2x8x128xbf16>, vector<2x8x8xf32> -> vector<2x8x8xf32>
    "tpu.trace_stop"() : () -> ()
    %cst_7 = arith.constant dense<0xFF800000> : vector<2x8xf32>
    %21 = vector.multi_reduction <maximumf>, %20, %cst_7 [2] : vector<2x8x8xf32> to vector<2x8xf32>
    %22 = vector.shape_cast %21 : vector<2x8xf32> to vector<2x8x1xf32>
    %23 = vector.broadcast %22 : vector<2x8x1xf32> to vector<2x8x8xf32>
    %24 = arith.subf %20, %23 : vector<2x8x8xf32>
    %25 = math.exp %24 : vector<2x8x8xf32>
    %cst_8 = arith.constant dense<0.000000e+00> : vector<2x8xf32>
    %26 = vector.multi_reduction <add>, %25, %cst_8 [2] : vector<2x8x8xf32> to vector<2x8xf32>
    %27 = vector.shape_cast %26 : vector<2x8xf32> to vector<2x8x1xf32>
    %28 = tpu.reciprocal %27 {approx = true} : vector<2x8x1xf32> -> vector<2x8x1xf32>
    %29 = vector.broadcast %28 : vector<2x8x1xf32> to vector<2x8x8xf32>
    %30 = arith.mulf %25, %29 : vector<2x8x8xf32>
    %31 = arith.truncf %30 : vector<2x8x8xf32> to vector<2x8x8xbf16>
    "tpu.trace_start"() <{level = 10 : i32, message = "bij,bjd->bid"}> : () -> ()
    %cst_9 = arith.constant dense<0.000000e+00> : vector<2x8x128xf32>
    %32 = tpu.matmul %31, %19, %cst_9 {dimension_numbers = #tpu.dot_dimension_numbers<[2], [1], [1], [2], [0, 0, 0, 1, 1, 2], [0], [0]>} : vector<2x8x8xbf16>, vector<2x8x128xbf16>, vector<2x8x128xf32> -> vector<2x8x128xf32>
    "tpu.trace_stop"() : () -> ()
    %33 = vector.shape_cast %32 : vector<2x8x128xf32> to vector<16x128xf32>
    %34 = arith.truncf %33 : vector<16x128xf32> to vector<16x128xbf16>
    %c0_10 = arith.constant 0 : index
    %c0_11 = arith.constant 0 : index
    %35 = vector.load %arg4[%c0_10, %c0_11] : memref<128x128xbf16, #tpu.memory_space<vmem>>, vector<128x128xbf16>
    %cst_12 = arith.constant dense<0.000000e+00> : vector<16x128xf32>
    %36 = tpu.matmul %34, %35, %cst_12 {dimension_numbers = #tpu.dot_dimension_numbers<[1], [0], [0], [1], [0, 0, 1, 1], [], []>} : vector<16x128xbf16>, vector<128x128xbf16>, vector<16x128xf32> -> vector<16x128xf32>
    %c0_13 = arith.constant 0 : index
    %c0_14 = arith.constant 0 : index
    %37 = vector.load %arg5[%c0_13, %c0_14] : memref<1x128xf32, #tpu.memory_space<vmem>>, vector<1x128xf32>
    %38 = vector.broadcast %37 : vector<1x128xf32> to vector<16x128xf32>
    %39 = arith.addf %36, %38 : vector<16x128xf32>
    %40 = arith.addf %39, %1 : vector<16x128xf32>
    %c0_15 = arith.constant 0 : index
    %c0_16 = arith.constant 0 : index
    %41 = vector.load %arg6[%c0_15, %c0_16] : memref<1x128xf32, #tpu.memory_space<vmem>>, vector<1x128xf32>
    %c0_17 = arith.constant 0 : index
    %c0_18 = arith.constant 0 : index
    %42 = vector.load %arg7[%c0_17, %c0_18] : memref<1x128xf32, #tpu.memory_space<vmem>>, vector<1x128xf32>
    %cst_19 = arith.constant dense<0.000000e+00> : vector<16xf32>
    %43 = vector.multi_reduction <add>, %40, %cst_19 [1] : vector<16x128xf32> to vector<16xf32>
    %44 = vector.shape_cast %43 : vector<16xf32> to vector<16x1xf32>
    %cst_20 = arith.constant 3.125000e-02 : f32
    %45 = vector.broadcast %cst_20 : f32 to vector<16x1xf32>
    %46 = arith.mulf %44, %45 : vector<16x1xf32>
    %47 = vector.broadcast %46 : vector<16x1xf32> to vector<16x128xf32>
    %48 = arith.subf %40, %47 : vector<16x128xf32>
    %cst_21 = arith.constant 0.000000e+00 : f32
    %49 = vector.shape_cast %5 : vector<1x128xi1> to vector<1x128xi1>
    %50 = vector.broadcast %49 : vector<1x128xi1> to vector<16x128xi1>
    %51 = vector.broadcast %cst_21 : f32 to vector<16x128xf32>
    %52 = arith.select %50, %48, %51 : vector<16x128xi1>, vector<16x128xf32>
    %53 = arith.mulf %52, %52 : vector<16x128xf32>
    %cst_22 = arith.constant dense<0.000000e+00> : vector<16xf32>
    %54 = vector.multi_reduction <add>, %53, %cst_22 [1] : vector<16x128xf32> to vector<16xf32>
    %55 = vector.shape_cast %54 : vector<16xf32> to vector<16x1xf32>
    %cst_23 = arith.constant 3.125000e-02 : f32
    %56 = vector.broadcast %cst_23 : f32 to vector<16x1xf32>
    %57 = arith.mulf %55, %56 : vector<16x1xf32>
    %cst_24 = arith.constant 9.99999974E-6 : f32
    %58 = vector.broadcast %cst_24 : f32 to vector<16x1xf32>
    %59 = arith.addf %57, %58 : vector<16x1xf32>
    %60 = math.rsqrt %59 : vector<16x1xf32>
    %61 = vector.broadcast %60 : vector<16x1xf32> to vector<16x128xf32>
    %62 = arith.mulf %52, %61 : vector<16x128xf32>
    %63 = vector.broadcast %41 : vector<1x128xf32> to vector<16x128xf32>
    %64 = arith.mulf %62, %63 : vector<16x128xf32>
    %65 = vector.broadcast %42 : vector<1x128xf32> to vector<16x128xf32>
    %66 = arith.addf %64, %65 : vector<16x128xf32>
    %67 = arith.truncf %66 : vector<16x128xf32> to vector<16x128xbf16>
    %c0_25 = arith.constant 0 : index
    %c0_26 = arith.constant 0 : index
    %68 = vector.load %arg8[%c0_25, %c0_26] : memref<128x128xbf16, #tpu.memory_space<vmem>>, vector<128x128xbf16>
    %cst_27 = arith.constant dense<0.000000e+00> : vector<16x128xf32>
    %69 = tpu.matmul %67, %68, %cst_27 {dimension_numbers = #tpu.dot_dimension_numbers<[1], [0], [0], [1], [0, 0, 1, 1], [], []>} : vector<16x128xbf16>, vector<128x128xbf16>, vector<16x128xf32> -> vector<16x128xf32>
    %c0_28 = arith.constant 0 : index
    %c0_29 = arith.constant 0 : index
    %70 = vector.load %arg9[%c0_28, %c0_29] : memref<1x128xf32, #tpu.memory_space<vmem>>, vector<1x128xf32>
    %71 = vector.broadcast %70 : vector<1x128xf32> to vector<16x128xf32>
    %72 = arith.addf %69, %71 : vector<16x128xf32>
    %cst_30 = arith.constant 0.000000e+00 : f32
    %73 = vector.broadcast %cst_30 : f32 to vector<16x128xf32>
    %74 = arith.maximumf %72, %73 : vector<16x128xf32>
    %75 = arith.truncf %74 : vector<16x128xf32> to vector<16x128xbf16>
    %c0_31 = arith.constant 0 : index
    %c0_32 = arith.constant 0 : index
    %76 = vector.load %arg10[%c0_31, %c0_32] : memref<128x128xbf16, #tpu.memory_space<vmem>>, vector<128x128xbf16>
    %cst_33 = arith.constant dense<0.000000e+00> : vector<16x128xf32>
    %77 = tpu.matmul %75, %76, %cst_33 {dimension_numbers = #tpu.dot_dimension_numbers<[1], [0], [0], [1], [0, 0, 1, 1], [], []>} : vector<16x128xbf16>, vector<128x128xbf16>, vector<16x128xf32> -> vector<16x128xf32>
    %c0_34 = arith.constant 0 : index
    %c0_35 = arith.constant 0 : index
    %78 = vector.load %arg11[%c0_34, %c0_35] : memref<1x128xf32, #tpu.memory_space<vmem>>, vector<1x128xf32>
    %79 = vector.broadcast %78 : vector<1x128xf32> to vector<16x128xf32>
    %80 = arith.addf %77, %79 : vector<16x128xf32>
    %81 = arith.addf %80, %66 : vector<16x128xf32>
    %c0_36 = arith.constant 0 : index
    %c0_37 = arith.constant 0 : index
    %82 = vector.load %arg12[%c0_36, %c0_37] : memref<1x128xf32, #tpu.memory_space<vmem>>, vector<1x128xf32>
    %c0_38 = arith.constant 0 : index
    %c0_39 = arith.constant 0 : index
    %83 = vector.load %arg13[%c0_38, %c0_39] : memref<1x128xf32, #tpu.memory_space<vmem>>, vector<1x128xf32>
    %cst_40 = arith.constant dense<0.000000e+00> : vector<16xf32>
    %84 = vector.multi_reduction <add>, %81, %cst_40 [1] : vector<16x128xf32> to vector<16xf32>
    %85 = vector.shape_cast %84 : vector<16xf32> to vector<16x1xf32>
    %cst_41 = arith.constant 3.125000e-02 : f32
    %86 = vector.broadcast %cst_41 : f32 to vector<16x1xf32>
    %87 = arith.mulf %85, %86 : vector<16x1xf32>
    %88 = vector.broadcast %87 : vector<16x1xf32> to vector<16x128xf32>
    %89 = arith.subf %81, %88 : vector<16x128xf32>
    %cst_42 = arith.constant 0.000000e+00 : f32
    %90 = vector.shape_cast %5 : vector<1x128xi1> to vector<1x128xi1>
    %91 = vector.broadcast %90 : vector<1x128xi1> to vector<16x128xi1>
    %92 = vector.broadcast %cst_42 : f32 to vector<16x128xf32>
    %93 = arith.select %91, %89, %92 : vector<16x128xi1>, vector<16x128xf32>
    %94 = arith.mulf %93, %93 : vector<16x128xf32>
    %cst_43 = arith.constant dense<0.000000e+00> : vector<16xf32>
    %95 = vector.multi_reduction <add>, %94, %cst_43 [1] : vector<16x128xf32> to vector<16xf32>
    %96 = vector.shape_cast %95 : vector<16xf32> to vector<16x1xf32>
    %cst_44 = arith.constant 3.125000e-02 : f32
    %97 = vector.broadcast %cst_44 : f32 to vector<16x1xf32>
    %98 = arith.mulf %96, %97 : vector<16x1xf32>
    %cst_45 = arith.constant 9.99999974E-6 : f32
    %99 = vector.broadcast %cst_45 : f32 to vector<16x1xf32>
    %100 = arith.addf %98, %99 : vector<16x1xf32>
    %101 = math.rsqrt %100 : vector<16x1xf32>
    %102 = vector.broadcast %101 : vector<16x1xf32> to vector<16x128xf32>
    %103 = arith.mulf %93, %102 : vector<16x128xf32>
    %104 = vector.broadcast %82 : vector<1x128xf32> to vector<16x128xf32>
    %105 = arith.mulf %103, %104 : vector<16x128xf32>
    %106 = vector.broadcast %83 : vector<1x128xf32> to vector<16x128xf32>
    %107 = arith.addf %105, %106 : vector<16x128xf32>
    %108 = vector.shape_cast %107 : vector<16x128xf32> to vector<2x8x128xf32>
    %c0_46 = arith.constant 0 : index
    %c0_47 = arith.constant 0 : index
    %c0_48 = arith.constant 0 : index
    %109 = vector.load %arg14[%c0_46, %c0_47, %c0_48] : memref<2x8x128xf32, #tpu.memory_space<vmem>>, vector<2x8x128xf32>
    tpu.vector_store %arg14[%c0_46, %c0_47, %c0_48], %108 {strides = array<i32>} : memref<2x8x128xf32, #tpu.memory_space<vmem>>, vector<2x8x128xf32>,
    return
  }
  func.func @transform_0(%arg0: i32) -> (i32, i32, i32) {
    %c0_i32 = arith.constant 0 : i32
    %c0_i32_0 = arith.constant 0 : i32
    %c0_i32_1 = arith.constant 0 : i32
    return %arg0, %c0_i32, %c0_i32_0 : i32, i32, i32
  }
  func.func @transform_1(%arg0: i32) -> (i32, i32) {
    %c0_i32 = arith.constant 0 : i32
    %c0_i32_0 = arith.constant 0 : i32
    %c0_i32_1 = arith.constant 0 : i32
    return %c0_i32, %c0_i32_0 : i32, i32
  }
  func.func @transform_2(%arg0: i32) -> (i32, i32) {
    %c0_i32 = arith.constant 0 : i32
    %c0_i32_0 = arith.constant 0 : i32
    %c0_i32_1 = arith.constant 0 : i32
    return %c0_i32, %c0_i32_0 : i32, i32
  }
  func.func @transform_3(%arg0: i32) -> (i32, i32) {
    %c0_i32 = arith.constant 0 : i32
    %c0_i32_0 = arith.constant 0 : i32
    %c0_i32_1 = arith.constant 0 : i32
    return %c0_i32, %c0_i32_0 : i32, i32
  }
  func.func @transform_4(%arg0: i32) -> (i32, i32) {
    %c0_i32 = arith.constant 0 : i32
    %c0_i32_0 = arith.constant 0 : i32
    %c0_i32_1 = arith.constant 0 : i32
    return %c0_i32, %c0_i32_0 : i32, i32
  }
  func.func @transform_5(%arg0: i32) -> (i32, i32) {
    %c0_i32 = arith.constant 0 : i32
    %c0_i32_0 = arith.constant 0 : i32
    %c0_i32_1 = arith.constant 0 : i32
    return %c0_i32, %c0_i32_0 : i32, i32
  }
  func.func @transform_6(%arg0: i32) -> (i32, i32) {
    %c0_i32 = arith.constant 0 : i32
    %c0_i32_0 = arith.constant 0 : i32
    %c0_i32_1 = arith.constant 0 : i32
    return %c0_i32, %c0_i32_0 : i32, i32
  }
  func.func @transform_7(%arg0: i32) -> (i32, i32) {
    %c0_i32 = arith.constant 0 : i32
    %c0_i32_0 = arith.constant 0 : i32
    %c0_i32_1 = arith.constant 0 : i32
    return %c0_i32, %c0_i32_0 : i32, i32
  }
  func.func @transform_8(%arg0: i32) -> (i32, i32) {
    %c0_i32 = arith.constant 0 : i32
    %c0_i32_0 = arith.constant 0 : i32
    %c0_i32_1 = arith.constant 0 : i32
    return %c0_i32, %c0_i32_0 : i32, i32
  }
  func.func @transform_9(%arg0: i32) -> (i32, i32) {
    %c0_i32 = arith.constant 0 : i32
    %c0_i32_0 = arith.constant 0 : i32
    %c0_i32_1 = arith.constant 0 : i32
    return %c0_i32, %c0_i32_0 : i32, i32
  }
  func.func @transform_10(%arg0: i32) -> (i32, i32) {
    %c0_i32 = arith.constant 0 : i32
    %c0_i32_0 = arith.constant 0 : i32
    %c0_i32_1 = arith.constant 0 : i32
    return %c0_i32, %c0_i32_0 : i32, i32
  }
  func.func @transform_11(%arg0: i32) -> (i32, i32) {
    %c0_i32 = arith.constant 0 : i32
    %c0_i32_0 = arith.constant 0 : i32
    %c0_i32_1 = arith.constant 0 : i32
    return %c0_i32, %c0_i32_0 : i32, i32
  }
  func.func @transform_12(%arg0: i32) -> (i32, i32) {
    %c0_i32 = arith.constant 0 : i32
    %c0_i32_0 = arith.constant 0 : i32
    %c0_i32_1 = arith.constant 0 : i32
    return %c0_i32, %c0_i32_0 : i32, i32
  }
  func.func @transform_13(%arg0: i32) -> (i32, i32, i32) {
    %c0_i32 = arith.constant 0 : i32
    %c0_i32_0 = arith.constant 0 : i32
    %c0_i32_1 = arith.constant 0 : i32
    return %arg0, %c0_i32, %c0_i32_0 : i32, i32, i32
  }
}

module attributes {stable_mosaic.version = 11 : i64} {
  func.func @att_kernel(%arg0: i32, %arg1: memref<2x8x128xf32, #tpu.memory_space<vmem>>, %arg2: memref<128x384xbf16, #tpu.memory_space<vmem>>, %arg3: memref<1x384xf32, #tpu.memory_space<vmem>>, %arg4: memref<128x128xbf16, #tpu.memory_space<vmem>>, %arg5: memref<1x128xf32, #tpu.memory_space<vmem>>, %arg6: memref<1x128xf32, #tpu.memory_space<vmem>>, %arg7: memref<1x128xf32, #tpu.memory_space<vmem>>, %arg8: memref<128x128xbf16, #tpu.memory_space<vmem>>, %arg9: memref<1x128xf32, #tpu.memory_space<vmem>>, %arg10: memref<128x128xbf16, #tpu.memory_space<vmem>>, %arg11: memref<1x128xf32, #tpu.memory_space<vmem>>, %arg12: memref<1x128xf32, #tpu.memory_space<vmem>>, %arg13: memref<1x128xf32, #tpu.memory_space<vmem>>, %arg14: memref<2x8x128xf32, #tpu.memory_space<vmem>>) attributes {dimension_semantics = [#tpu.dimension_semantics<parallel>], iteration_bounds = array<i64: 1>, scalar_prefetch = 0 : i64, scratch_operands = 0 : i64, tpu.core_type = #tpu.core_type<tc>, window_params = [{transform_indices = @transform_0, window_bounds = array<i64: 2, 8, 128>}, {pipeline_mode = #tpu.pipeline_mode<synchronous>, transform_indices = @transform_1, window_bounds = array<i64: 128, 384>}, {pipeline_mode = #tpu.pipeline_mode<synchronous>, transform_indices = @transform_2, window_bounds = array<i64: 1, 384>}, {pipeline_mode = #tpu.pipeline_mode<synchronous>, transform_indices = @transform_3, window_bounds = array<i64: 128, 128>}, {pipeline_mode = #tpu.pipeline_mode<synchronous>, transform_indices = @transform_4, window_bounds = array<i64: 1, 128>}, {pipeline_mode = #tpu.pipeline_mode<synchronous>, transform_indices = @transform_5, window_bounds = array<i64: 1, 128>}, {pipeline_mode = #tpu.pipeline_mode<synchronous>, transform_indices = @transform_6, window_bounds = array<i64: 1, 128>}, {pipeline_mode = #tpu.pipeline_mode<synchronous>, transform_indices = @transform_7, window_bounds = array<i64: 128, 128>}, {pipeline_mode = #tpu.pipeline_mode<synchronous>, transform_indices = @transform_8, window_bounds = array<i64: 1, 128>}, {pipeline_mode = #tpu.pipeline_mode<synchronous>, transform_indices = @transform_9, window_bounds = array<i64: 128, 128>}, {pipeline_mode = #tpu.pipeline_mode<synchronous>, transform_indices = @transform_10, window_bounds = array<i64: 1, 128>}, {pipeline_mode = #tpu.pipeline_mode<synchronous>, transform_indices = @transform_11, window_bounds = array<i64: 1, 128>}, {pipeline_mode = #tpu.pipeline_mode<synchronous>, transform_indices = @transform_12, window_bounds = array<i64: 1, 128>}, {transform_indices = @transform_13, window_bounds = array<i64: 2, 8, 128>}]} {
    %c0 = arith.constant 0 : index
    %c0_0 = arith.constant 0 : index
    %c0_1 = arith.constant 0 : index
    %0 = vector.load %arg1[%c0, %c0_0, %c0_1] : memref<2x8x128xf32, #tpu.memory_space<vmem>>, vector<2x8x128xf32>
    %1 = vector.shape_cast %0 : vector<2x8x128xf32> to vector<16x128xf32>
    %2 = arith.truncf %1 : vector<16x128xf32> to vector<16x128xbf16>
    %3 = tpu.iota {dimensions = array<i32: 1>} : vector<1x128xi32>
    %c32_i32 = arith.constant 32 : i32
    %4 = vector.broadcast %c32_i32 : i32 to vector<1x128xi32>
    %5 = arith.cmpi slt, %3, %4 : vector<1x128xi32>
    %c0_2 = arith.constant 0 : index
    %c0_3 = arith.constant 0 : index
    %6 = vector.load %arg2[%c0_2, %c0_3] : memref<128x384xbf16, #tpu.memory_space<vmem>>, vector<128x384xbf16>
    %cst = arith.constant dense<0.000000e+00> : vector<16x384xf32>
    %7 = tpu.matmul %2, %6, %cst {dimension_numbers = #tpu.dot_dimension_numbers<[1], [0], [0], [1], [0, 0, 1, 1], [], []>} : vector<16x128xbf16>, vector<128x384xbf16>, vector<16x384xf32> -> vector<16x384xf32>
    %c0_4 = arith.constant 0 : index
    %c0_5 = arith.constant 0 : index
    %8 = vector.load %arg3[%c0_4, %c0_5] : memref<1x384xf32, #tpu.memory_space<vmem>>, vector<1x384xf32>
    %9 = vector.broadcast %8 : vector<1x384xf32> to vector<16x384xf32>
    %10 = arith.addf %7, %9 : vector<16x384xf32>
    %11 = vector.extract_strided_slice %10 {offsets = [0, 0], sizes = [16, 128], strides = [1, 1]} : vector<16x384xf32> to vector<16x128xf32>
    %12 = vector.shape_cast %11 : vector<16x128xf32> to vector<2x8x128xf32>
    %13 = arith.truncf %12 : vector<2x8x128xf32> to vector<2x8x128xbf16>
    %14 = vector.extract_strided_slice %10 {offsets = [0, 128], sizes = [16, 128], strides = [1, 1]} : vector<16x384xf32> to vector<16x128xf32>
    %15 = vector.shape_cast %14 : vector<16x128xf32> to vector<2x8x128xf32>
    %16 = arith.truncf %15 : vector<2x8x128xf32> to vector<2x8x128xbf16>
    %17 = vector.extract_strided_slice %10 {offsets = [0, 256], sizes = [16, 128], strides = [1, 1]} : vector<16x384xf32> to vector<16x128xf32>
    %18 = vector.shape_cast %17 : vector<16x128xf32> to vector<2x8x128xf32>
    %19 = arith.truncf %18 : vector<2x8x128xf32> to vector<2x8x128xbf16>
    "tpu.trace_start"() <{level = 10 : i32, message = "bik,bjk->bij"}> : () -> ()
    %cst_6 = arith.constant dense<0.000000e+00> : vector<2x8x8xf32>
    %20 = tpu.matmul %13, %16, %cst_6 {dimension_numbers = #tpu.dot_dimension_numbers<[2], [2], [1], [1], [0, 0, 0, 1, 1, 1], [0], [0]>} : vector<2x8x128xbf16>, vector<2x8x128xbf16>, vector<2x8x8xf32> -> vector<2x8x8xf32>
    "tpu.trace_stop"() : () -> ()
    %cst_7 = arith.constant dense<0xFF800000> : vector<2x8xf32>
    %21 = vector.multi_reduction <maximumf>, %20, %cst_7 [2] : vector<2x8x8xf32> to vector<2x8xf32>
    %22 = vector.shape_cast %21 : vector<2x8xf32> to vector<2x8x1xf32>
    %23 = vector.broadcast %22 : vector<2x8x1xf32> to vector<2x8x8xf32>
    %24 = arith.subf %20, %23 : vector<2x8x8xf32>
    %25 = math.exp %24 : vector<2x8x8xf32>
    %cst_8 = arith.constant dense<0.000000e+00> : vector<2x8xf32>
    %26 = vector.multi_reduction <add>, %25, %cst_8 [2] : vector<2x8x8xf32> to vector<2x8xf32>
    %27 = vector.shape_cast %26 : vector<2x8xf32> to vector<2x8x1xf32>
    %28 = tpu.reciprocal %27 {approx = true} : vector<2x8x1xf32> -> vector<2x8x1xf32>
    %29 = vector.broadcast %28 : vector<2x8x1xf32> to vector<2x8x8xf32>
    %30 = arith.mulf %25, %29 : vector<2x8x8xf32>
    %31 = arith.truncf %30 : vector<2x8x8xf32> to vector<2x8x8xbf16>
    "tpu.trace_start"() <{level = 10 : i32, message = "bij,bjd->bid"}> : () -> ()
    %cst_9 = arith.constant dense<0.000000e+00> : vector<2x8x128xf32>
    %32 = tpu.matmul %31, %19, %cst_9 {dimension_numbers = #tpu.dot_dimension_numbers<[2], [1], [1], [2], [0, 0, 0, 1, 1, 2], [0], [0]>} : vector<2x8x8xbf16>, vector<2x8x128xbf16>, vector<2x8x128xf32> -> vector<2x8x128xf32>
    "tpu.trace_stop"() : () -> ()
    %33 = vector.shape_cast %32 : vector<2x8x128xf32> to vector<16x128xf32>
    %34 = arith.truncf %33 : vector<16x128xf32> to vector<16x128xbf16>
    %c0_10 = arith.constant 0 : index
    %c0_11 = arith.constant 0 : index
    %35 = vector.load %arg4[%c0_10, %c0_11] : memref<128x128xbf16, #tpu.memory_space<vmem>>, vector<128x128xbf16>
    %cst_12 = arith.constant dense<0.000000e+00> : vector<16x128xf32>
    %36 = tpu.matmul %34, %35, %cst_12 {dimension_numbers = #tpu.dot_dimension_numbers<[1], [0], [0], [1], [0, 0, 1, 1], [], []>} : vector<16x128xbf16>, vector<128x128xbf16>, vector<16x128xf32> -> vector<16x128xf32>
    %c0_13 = arith.constant 0 : index
    %c0_14 = arith.constant 0 : index
    %37 = vector.load %arg5[%c0_13, %c0_14] : memref<1x128xf32, #tpu.memory_space<vmem>>, vector<1x128xf32>
    %38 = vector.broadcast %37 : vector<1x128xf32> to vector<16x128xf32>
    %39 = arith.addf %36, %38 : vector<16x128xf32>
    %40 = arith.addf %39, %1 : vector<16x128xf32>
    %c0_15 = arith.constant 0 : index
    %c0_16 = arith.constant 0 : index
    %41 = vector.load %arg6[%c0_15, %c0_16] : memref<1x128xf32, #tpu.memory_space<vmem>>, vector<1x128xf32>
    %c0_17 = arith.constant 0 : index
    %c0_18 = arith.constant 0 : index
    %42 = vector.load %arg7[%c0_17, %c0_18] : memref<1x128xf32, #tpu.memory_space<vmem>>, vector<1x128xf32>
    %cst_19 = arith.constant dense<0.000000e+00> : vector<16xf32>
    %43 = vector.multi_reduction <add>, %40, %cst_19 [1] : vector<16x128xf32> to vector<16xf32>
    %44 = vector.shape_cast %43 : vector<16xf32> to vector<16x1xf32>
    %cst_20 = arith.constant 3.125000e-02 : f32
    %45 = vector.broadcast %cst_20 : f32 to vector<16x1xf32>
    %46 = arith.mulf %44, %45 : vector<16x1xf32>
    %47 = vector.broadcast %46 : vector<16x1xf32> to vector<16x128xf32>
    %48 = arith.subf %40, %47 : vector<16x128xf32>
    %cst_21 = arith.constant 0.000000e+00 : f32
    %49 = vector.shape_cast %5 : vector<1x128xi1> to vector<1x128xi1>
    %50 = vector.broadcast %49 : vector<1x128xi1> to vector<16x128xi1>
    %51 = vector.broadcast %cst_21 : f32 to vector<16x128xf32>
    %52 = arith.select %50, %48, %51 : vector<16x128xi1>, vector<16x128xf32>
    %53 = arith.mulf %52, %52 : vector<16x128xf32>
    %cst_22 = arith.constant dense<0.000000e+00> : vector<16xf32>
    %54 = vector.multi_reduction <add>, %53, %cst_22 [1] : vector<16x128xf32> to vector<16xf32>
    %55 = vector.shape_cast %54 : vector<16xf32> to vector<16x1xf32>
    %cst_23 = arith.constant 3.125000e-02 : f32
    %56 = vector.broadcast %cst_23 : f32 to vector<16x1xf32>
    %57 = arith.mulf %55, %56 : vector<16x1xf32>
    %cst_24 = arith.constant 9.99999974E-6 : f32
    %58 = vector.broadcast %cst_24 : f32 to vector<16x1xf32>
    %59 = arith.addf %57, %58 : vector<16x1xf32>
    %60 = math.rsqrt %59 : vector<16x1xf32>
    %61 = vector.broadcast %60 : vector<16x1xf32> to vector<16x128xf32>
    %62 = arith.mulf %52, %61 : vector<16x128xf32>
    %63 = vector.broadcast %41 : vector<1x128xf32> to vector<16x128xf32>
    %64 = arith.mulf %62, %63 : vector<16x128xf32>
    %65 = vector.broadcast %42 : vector<1x128xf32> to vector<16x128xf32>
    %66 = arith.addf %64, %65 : vector<16x128xf32>
    %67 = arith.truncf %66 : vector<16x128xf32> to vector<16x128xbf16>
    %c0_25 = arith.constant 0 : index
    %c0_26 = arith.constant 0 : index
    %68 = vector.load %arg8[%c0_25, %c0_26] : memref<128x128xbf16, #tpu.memory_space<vmem>>, vector<128x128xbf16>
    %cst_27 = arith.constant dense<0.000000e+00> : vector<16x128xf32>
    %69 = tpu.matmul %67, %68, %cst_27 {dimension_numbers = #tpu.dot_dimension_numbers<[1], [0], [0], [1], [0, 0, 1, 1], [], []>} : vector<16x128xbf16>, vector<128x128xbf16>, vector<16x128xf32> -> vector<16x128xf32>
    %c0_28 = arith.constant 0 : index
    %c0_29 = arith.constant 0 : index
    %70 = vector.load %arg9[%c0_28, %c0_29] : memref<1x128xf32, #tpu.memory_space<vmem>>, vector<1x128xf32>
    %71 = vector.broadcast %70 : vector<1x128xf32> to vector<16x128xf32>
    %72 = arith.addf %69, %71 : vector<16x128xf32>
    %cst_30 = arith.constant 0.000000e+00 : f32
    %73 = vector.broadcast %cst_30 : f32 to vector<16x128xf32>
    %74 = arith.maximumf %72, %73 : vector<16x128xf32>
    %75 = arith.truncf %74 : vector<16x128xf32> to vector<16x128xbf16>
    %c0_31 = arith.constant 0 : index
    %c0_32 = arith.constant 0 : index
    %76 = vector.load %arg10[%c0_31, %c0_32] : memref<128x128xbf16, #tpu.memory_space<vmem>>, vector<128x128xbf16>
    %cst_33 = arith.constant dense<0.000000e+00> : vector<16x128xf32>
    %77 = tpu.matmul %75, %76, %cst_33 {dimension_numbers = #tpu.dot_dimension_numbers<[1], [0], [0], [1], [0, 0, 1, 1], [], []>} : vector<16x128xbf16>, vector<128x128xbf16>, vector<16x128xf32> -> vector<16x128xf32>
    %c0_34 = arith.constant 0 : index
    %c0_35 = arith.constant 0 : index
    %78 = vector.load %arg11[%c0_34, %c0_35] : memref<1x128xf32, #tpu.memory_space<vmem>>, vector<1x128xf32>
    %79 = vector.broadcast %78 : vector<1x128xf32> to vector<16x128xf32>
    %80 = arith.addf %77, %79 : vector<16x128xf32>
    %81 = arith.addf %80, %66 : vector<16x128xf32>
    %c0_36 = arith.constant 0 : index
    %c0_37 = arith.constant 0 : index
    %82 = vector.load %arg12[%c0_36, %c0_37] : memref<1x128xf32, #tpu.memory_space<vmem>>, vector<1x128xf32>
    %c0_38 = arith.constant 0 : index
    %c0_39 = arith.constant 0 : index
    %83 = vector.load %arg13[%c0_38, %c0_39] : memref<1x128xf32, #tpu.memory_space<vmem>>, vector<1x128xf32>
    %cst_40 = arith.constant dense<0.000000e+00> : vector<16xf32>
    %84 = vector.multi_reduction <add>, %81, %cst_40 [1] : vector<16x128xf32> to vector<16xf32>
    %85 = vector.shape_cast %84 : vector<16xf32> to vector<16x1xf32>
    %cst_41 = arith.constant 3.125000e-02 : f32
    %86 = vector.broadcast %cst_41 : f32 to vector<16x1xf32>
    %87 = arith.mulf %85, %86 : vector<16x1xf32>
    %88 = vector.broadcast %87 : vector<16x1xf32> to vector<16x128xf32>
    %89 = arith.subf %81, %88 : vector<16x128xf32>
    %cst_42 = arith.constant 0.000000e+00 : f32
    %90 = vector.shape_cast %5 : vector<1x128xi1> to vector<1x128xi1>
    %91 = vector.broadcast %90 : vector<1x128xi1> to vector<16x128xi1>
    %92 = vector.broadcast %cst_42 : f32 to vector<16x128xf32>
    %93 = arith.select %91, %89, %92 : vector<16x128xi1>, vector<16x128xf32>
    %94 = arith.mulf %93, %93 : vector<16x128xf32>
    %cst_43 = arith.constant dense<0.000000e+00> : vector<16xf32>
    %95 = vector.multi_reduction <add>, %94, %cst_43 [1] : vector<16x128xf32> to vector<16xf32>
    %96 = vector.shape_cast %95 : vector<16xf32> to vector<16x1xf32>
    %cst_44 = arith.constant 3.125000e-02 : f32
    %97 = vector.broadcast %cst_44 : f32 to vector<16x1xf32>
    %98 = arith.mulf %96, %97 : vector<16x1xf32>
    %cst_45 = arith.constant 9.99999974E-6 : f32
    %99 = vector.broadcast %cst_45 : f32 to vector<16x1xf32>
    %100 = arith.addf %98, %99 : vector<16x1xf32>
    %101 = math.rsqrt %100 : vector<16x1xf32>
    %102 = vector.broadcast %101 : vector<16x1xf32> to vector<16x128xf32>
    %103 = arith.mulf %93, %102 : vector<16x128xf32>
    %104 = vector.broadcast %82 : vector<1x128xf32> to vector<16x128xf32>
    %105 = arith.mulf %103, %104 : vector<16x128xf32>
    %106 = vector.broadcast %83 : vector<1x128xf32> to vector<16x128xf32>
    %107 = arith.addf %105, %106 : vector<16x128xf32>
    %108 = vector.shape_cast %107 : vector<16x128xf32> to vector<2x8x128xf32>
    %c0_46 = arith.constant 0 : index
    %c0_47 = arith.constant 0 : index
    %c0_48 = arith.constant 0 : index
    %109 = vector.load %arg14[%c0_46, %c0_47, %c0_48] : memref<2x8x128xf32, #tpu.memory_space<vmem>>, vector<2x8x128xf32>
    tpu.vector_store %arg14[%c0_46, %c0_47, %c0_48], %108 {strides = array<i32>} : memref<2x8x128xf32, #tpu.memory_space<vmem>>, vector<2x8x128xf32>,
    return
  }
  func.func @transform_0(%arg0: i32) -> (i32, i32, i32) {
    %c0_i32 = arith.constant 0 : i32
    %c0_i32_0 = arith.constant 0 : i32
    %c0_i32_1 = arith.constant 0 : i32
    return %arg0, %c0_i32, %c0_i32_0 : i32, i32, i32
  }
  func.func @transform_1(%arg0: i32) -> (i32, i32) {
    %c0_i32 = arith.constant 0 : i32
    %c0_i32_0 = arith.constant 0 : i32
    %c0_i32_1 = arith.constant 0 : i32
    return %c0_i32, %c0_i32_0 : i32, i32
  }
  func.func @transform_2(%arg0: i32) -> (i32, i32) {
    %c0_i32 = arith.constant 0 : i32
    %c0_i32_0 = arith.constant 0 : i32
    %c0_i32_1 = arith.constant 0 : i32
    return %c0_i32, %c0_i32_0 : i32, i32
  }
  func.func @transform_3(%arg0: i32) -> (i32, i32) {
    %c0_i32 = arith.constant 0 : i32
    %c0_i32_0 = arith.constant 0 : i32
    %c0_i32_1 = arith.constant 0 : i32
    return %c0_i32, %c0_i32_0 : i32, i32
  }
  func.func @transform_4(%arg0: i32) -> (i32, i32) {
    %c0_i32 = arith.constant 0 : i32
    %c0_i32_0 = arith.constant 0 : i32
    %c0_i32_1 = arith.constant 0 : i32
    return %c0_i32, %c0_i32_0 : i32, i32
  }
  func.func @transform_5(%arg0: i32) -> (i32, i32) {
    %c0_i32 = arith.constant 0 : i32
    %c0_i32_0 = arith.constant 0 : i32
    %c0_i32_1 = arith.constant 0 : i32
    return %c0_i32, %c0_i32_0 : i32, i32
  }
  func.func @transform_6(%arg0: i32) -> (i32, i32) {
    %c0_i32 = arith.constant 0 : i32
    %c0_i32_0 = arith.constant 0 : i32
    %c0_i32_1 = arith.constant 0 : i32
    return %c0_i32, %c0_i32_0 : i32, i32
  }
  func.func @transform_7(%arg0: i32) -> (i32, i32) {
    %c0_i32 = arith.constant 0 : i32
    %c0_i32_0 = arith.constant 0 : i32
    %c0_i32_1 = arith.constant 0 : i32
    return %c0_i32, %c0_i32_0 : i32, i32
  }
  func.func @transform_8(%arg0: i32) -> (i32, i32) {
    %c0_i32 = arith.constant 0 : i32
    %c0_i32_0 = arith.constant 0 : i32
    %c0_i32_1 = arith.constant 0 : i32
    return %c0_i32, %c0_i32_0 : i32, i32
  }
  func.func @transform_9(%arg0: i32) -> (i32, i32) {
    %c0_i32 = arith.constant 0 : i32
    %c0_i32_0 = arith.constant 0 : i32
    %c0_i32_1 = arith.constant 0 : i32
    return %c0_i32, %c0_i32_0 : i32, i32
  }
  func.func @transform_10(%arg0: i32) -> (i32, i32) {
    %c0_i32 = arith.constant 0 : i32
    %c0_i32_0 = arith.constant 0 : i32
    %c0_i32_1 = arith.constant 0 : i32
    return %c0_i32, %c0_i32_0 : i32, i32
  }
  func.func @transform_11(%arg0: i32) -> (i32, i32) {
    %c0_i32 = arith.constant 0 : i32
    %c0_i32_0 = arith.constant 0 : i32
    %c0_i32_1 = arith.constant 0 : i32
    return %c0_i32, %c0_i32_0 : i32, i32
  }
  func.func @transform_12(%arg0: i32) -> (i32, i32) {
    %c0_i32 = arith.constant 0 : i32
    %c0_i32_0 = arith.constant 0 : i32
    %c0_i32_1 = arith.constant 0 : i32
    return %c0_i32, %c0_i32_0 : i32, i32
  }
  func.func @transform_13(%arg0: i32) -> (i32, i32, i32) {
    %c0_i32 = arith.constant 0 : i32
    %c0_i32_0 = arith.constant 0 : i32
    %c0_i32_1 = arith.constant 0 : i32
    return %arg0, %c0_i32, %c0_i32_0 : i32, i32, i32
  }
}

</mosaic_0001>

<bundles_post_ra>
// kernel: tpu_custom_call.1
= control target key start
LH: loop header
LB: loop body
LE: loop exit
PB: predicated region body
PF: predicated region fallthrough
CT: control target
= control target key end

     0   :  { %18 = vsyncpa [#allocation3], 0  ;;  %s1678_s0 = inlined_call_operand.hbm [shape: f32[2,8,128], index: 0, kind: input, shape index: {}]   ;;  %s1679_s1 = inlined_call_operand.hbm [shape: bf16[128,384], index: 1, kind: input, shape index: {}]   ;;  %s1680_s2 = inlined_call_operand.vmem [shape: f32[1,384], index: 2, kind: input, shape index: {}]   ;;  %s1681_s3 = inlined_call_operand.hbm [shape: bf16[128,128], index: 3, kind: input, shape index: {}]   ;;  %s1682_s4 = inlined_call_operand.vmem [shape: f32[1,128], index: 4, kind: input, shape index: {}]   ;;  %s1683_s5 = inlined_call_operand.vmem [shape: f32[1,128], index: 5, kind: input, shape index: {}]   ;;  %s1684_s6 = inlined_call_operand.vmem [shape: f32[1,128], index: 6, kind: input, shape index: {}]   ;;  %s1685_s7 = inlined_call_operand.hbm [shape: bf16[128,128], index: 7, kind: input, shape index: {}]   ;;  %s1686_s8 = inlined_call_operand.vmem [shape: f32[1,128], index: 8, kind: input, shape index: {}]   ;;  %s1687_s9 = inlined_call_operand.hbm [shape: bf16[128,128], index: 9, kind: input, shape index: {}]   ;;  %s1688_s10 = inlined_call_operand.vmem [shape: f32[1,128], index: 10, kind: input, shape index: {}]   ;;  %s1689_s11 = inlined_call_operand.vmem [shape: f32[1,128], index: 11, kind: input, shape index: {}]   ;;  %s1690_s12 = inlined_call_operand.vmem [shape: f32[1,128], index: 12, kind: input, shape index: {}]   ;;  %s1691_s13 = inlined_call_operand.hbm [shape: f32[2,8,128], index: 13, kind: output, shape index: {}]  }
   0x1   :  { %19 = vsyncpa [#allocation6], 0 }
   0x2   :  { %20 = vsyncpa [#allocation9], 0 }
   0x3   :  { %21 = vsyncpa [#allocation4], 0  ;;  %s1457_s25 = smov [#allocation5]  }
   0x4   :  { %s39_s26 = sshll.u32 %s1457_s25, 4  ;;  %s40_s26 = int_to_ptr.vmem [resolvable:$true] %s39_s26 }
   0x5   :  { %s1337_s27 = scalar_lea.vmem %s40_s26, 3072  ;;  %p1342_p1 = scmp.lt.s32.totalorder %s40_s26, %s40_s26 }
   0x6   :  { %p1338_p0 = scmp.ne.s32.totalorder %s40_s26, %s1337_s27  ;;  %p1343_p2 = scmp.lt.s32.totalorder %s1337_s27, %s1337_s27 }
   0x8   :  { %p1344_p3 = por %p1343_p2, %p1342_p1 }
   0xa   :  { %p1345_p4 = pnand %p1344_p3, %p1338_p0 }
   0xc   :  { %1348 = shalt.err (!%p1345_p4)
}
   0xd   :  { %s1458_s28 = smov 192   ;;  %s1459_s29 = smov 12  }
   0xe   :  { %45 = dma.hbm_to_vmem [thread:$0]  %s1679_s1, 3072, %s40_s26, [#allocation6], %s1458_s28, %s1458_s28, %s1459_s29  }
   0xf   :  { %s1460_s15 = smov [#allocation8]   ;;  %s1461_s17 = smov [#allocation2]  }
  0x10   :  { %s71_s16 = sshll.u32 %s1460_s15, 4  ;;  %s27_s18 = sshll.u32 %s1461_s17, 4  ;;  %s72_s16 = int_to_ptr.vmem [resolvable:$true] %s71_s16  ;;  %s28_s18 = int_to_ptr.vmem [resolvable:$true] %s27_s18 }
  0x11   :  { %s1357_s19 = scalar_lea.vmem %s72_s16, 1024  ;;  %p1362_p6 = scmp.lt.s32.totalorder %s72_s16, %s72_s16 }
  0x12   :  { %p1358_p5 = scmp.ne.s32.totalorder %s72_s16, %s1357_s19  ;;  %p1363_p7 = scmp.lt.s32.totalorder %s1357_s19, %s1357_s19 }
  0x14   :  { %p1364_p8 = por %p1363_p7, %p1362_p6 }
  0x16   :  { %p1365_p9 = pnand %p1364_p8, %p1358_p5 }
  0x18   :  { %1368 = shalt.err (!%p1365_p9)
}
  0x19   :  { %s1462_s20 = smov 64   ;;  %s1463_s21 = smov 4  }
  0x1a   :  { %77 = dma.hbm_to_vmem [thread:$0]  %s1685_s7, 1024, %s72_s16, [#allocation9], %s1462_s20, %s1462_s20, %s1463_s21  }
  0x1b   :  { %s1377_s1 = scalar_lea.vmem %s28_s18, 256  ;;  %p1382_p11 = scmp.lt.s32.totalorder %s28_s18, %s28_s18 }
  0x1c   :  { %p1378_p10 = scmp.ne.s32.totalorder %s28_s18, %s1377_s1  ;;  %p1383_p12 = scmp.lt.s32.totalorder %s1377_s1, %s1377_s1 }
  0x1e   :  { %p1384_p13 = por %p1383_p12, %p1382_p11 }
  0x20   :  { %p1385_p0 = pnand %p1384_p13, %p1378_p10 }
  0x22   :  { %1388 = shalt.err (!%p1385_p0)
}
  0x23   :  { %s1464_s24 = smov 128   ;;  %s1465_s25 = smov 8  }
  0x24   :  { %33 = dma.hbm_to_vmem [thread:$0]  %s1678_s0, 256, %s28_s18, [#allocation3], %s1464_s24, %s1464_s24, %s1465_s25  }
  0x25   :  { %s1466_s28 = smov [#allocation7]   ;;  %s1467_s7 = smov [#allocation10]  }
  0x26   :  { %s53_s29 = sshll.u32 %s1466_s28, 4  ;;  %s85_s30 = sshll.u32 %s1467_s7, 4  ;;  %s54_s29 = int_to_ptr.vmem [resolvable:$true] %s53_s29  ;;  %s86_s30 = int_to_ptr.vmem [resolvable:$true] %s85_s30 }
  0x27   :  { %s1397_s14 = scalar_lea.vmem %s54_s29, 1024  ;;  %p1402_p2 = scmp.lt.s32.totalorder %s54_s29, %s54_s29 }
  0x28   :  { %p1398_p1 = scmp.ne.s32.totalorder %s54_s29, %s1397_s14  ;;  %p1403_p3 = scmp.lt.s32.totalorder %s1397_s14, %s1397_s14 }
  0x2a   :  { %p1404_p4 = por %p1403_p3, %p1402_p2 }
  0x2c   :  { %p1405_p5 = pnand %p1404_p4, %p1398_p1 }
  0x2e   :  { %1408 = shalt.err (!%p1405_p5)
}
  0x2f   :  { %59 = dma.hbm_to_vmem [thread:$0]  %s1681_s3, 1024, %s54_s29, [#allocation6], %s1462_s20, %s1462_s20, %s1463_s21  }
  0x30   :  { %s1417_s0 = scalar_lea.vmem %s86_s30, 1024  ;;  %p1422_p7 = scmp.lt.s32.totalorder %s86_s30, %s86_s30 }
  0x31   :  { %p1418_p6 = scmp.ne.s32.totalorder %s86_s30, %s1417_s0  ;;  %p1423_p8 = scmp.lt.s32.totalorder %s1417_s0, %s1417_s0 }
  0x33   :  { %p1424_p9 = por %p1423_p8, %p1422_p7 }
  0x35   :  { %p1425_p10 = pnand %p1424_p9, %p1418_p6 }
  0x37   :  { %1428 = shalt.err (!%p1425_p10)
}
  0x38   :  { %91 = dma.hbm_to_vmem [thread:$0]  %s1687_s9, 1024, %s86_s30, [#allocation9], %s1462_s20, %s1462_s20, %s1463_s21  }
  0x39   :  { %1449 = dma.done.wait [#allocation3], 256  }
  0x3a   :  { %1450 = vsyncadd [#allocation3], 4294967040 }
  0x3b   :  { %1451 = dma.done.wait [#allocation6], 4096  }
  0x3c   :  { %1452 = vsyncadd [#allocation6], 4294963200 }
  0x3d   :  { %1453 = dma.done.wait [#allocation9], 2048  }
  0x3e   :  { %1454 = vsyncadd [#allocation9], 4294965248  ;;  %v1468_v0 = vmov 0   ;;  %v1469_v1 = vmov 0.0   ;;  %v1257_v2 = vld [vmem:[#allocation5 + $0xac] ss:$12 sps:$4 sm:$0xff]   ;;  %v117_v29 = vlaneseq }
  0x3f   :  { %329 = vmatprep.mubr.bf16.mxu0 %v1468_v0  ;;  %1138 = vmatprep.subr.bf16.mxu1 %v1469_v1  ;;  %v1259_v3 = vld [vmem:[#allocation5 + $0xa8] ss:$12 sps:$4 sm:$0xff]   ;;  %v1262_v5 = vld [vmem:[#allocation5 + $0x90] ss:$12 sps:$4 sm:$0xff]   ;;  %v1265_v7 = vld [vmem:[#allocation5 + $0x78] ss:$12 sps:$4 sm:$0xff]  }
  0x40   :  { %297 = vmatprep.subr.bf16.mxu0 %v1257_v2  ;;  %v1260_v4 = vld [vmem:[#allocation5 + $0x94] ss:$12 sps:$4 sm:$0xff]   ;;  %v1263_v6 = vld [vmem:[#allocation5 + $0x7c] ss:$12 sps:$4 sm:$0xff]   ;;  %v1266_v8 = vld [vmem:[#allocation5 + $0x64] ss:$12 sps:$4 sm:$0xff]  }
  0x41   :  { %298 = vmatpush1.bf16.msra.mxu0 %v1259_v3  ;;  %v1268_v9 = vld [vmem:[#allocation5 + $0x60] ss:$12 sps:$4 sm:$0xff]   ;;  %v1281_v11 = vld [vmem:[#allocation5 + $0xb0] ss:$12 sps:$4 sm:$0xff]   ;;  %v1282_v12 = vld [vmem:[#allocation5 + $0x98] ss:$12 sps:$4 sm:$0xff]  }
  0x42   :  { %299 = vmatprep.subr.bf16.mxu0 %v1260_v4  ;;  %v1269_v10 = vld [vmem:[#allocation5 + $0x4c] ss:$12 sps:$4 sm:$0xff]   ;;  %1139 = vmatpush3.bf16.msra.mxu1 %v1281_v11  ;;  %v1271_v13 = vld [vmem:[#allocation5 + $0x48] ss:$12 sps:$4 sm:$0xff]   ;;  %v1274_v16 = vld [vmem:[#allocation5 + $0x30] ss:$12 sps:$4 sm:$0xff]  }
  0x43   :  { %1140 = vmatprep.subr.bf16.mxu1 %v1469_v1  ;;  %v1272_v14 = vld [vmem:[#allocation5 + $0x34] ss:$12 sps:$4 sm:$0xff]   ;;  %v1275_v17 = vld [vmem:[#allocation5 + $0x1c] ss:$12 sps:$4 sm:$0xff]   ;;  %v1277_v19 = vld [vmem:[#allocation5 + $0x18] ss:$12 sps:$4 sm:$0xff]  }
  0x44   :  { %v1283_v15 = vld [vmem:[#allocation5 + $0x80] ss:$12 sps:$4 sm:$0xff]   ;;  %v1284_v18 = vld [vmem:[#allocation5 + $0x68] ss:$12 sps:$4 sm:$0xff]   ;;  %v1278_v20 = vld [vmem:[#allocation5 + $0x4] ss:$12 sps:$4 sm:$0xff]  }
  0x45   :  { %300 = vmatpush1.bf16.msra.mxu0 %v1262_v5  ;;  %v1285_v21 = vld [vmem:[#allocation5 + $0x50] ss:$12 sps:$4 sm:$0xff]   ;;  %v1280_v22 = vld [vmem:[#allocation5] ss:$12 sps:$4 sm:$0xff]   ;;  %v1286_v25 = vld [vmem:[#allocation5 + $0x38] ss:$12 sps:$4 sm:$0xff]  }
  0x46   :  { %301 = vmatprep.subr.bf16.mxu0 %v1263_v6  ;;  %1141 = vmatpush3.bf16.msra.mxu1 %v1282_v12  ;;  %v1573_v23 = vld [vmem:[#allocation2] sm:$0xff]  ;;  %v1575_v24 = vld [vmem:[#allocation2 + $0x8] sm:$0xff]  ;;  %v1287_v27 = vld [vmem:[#allocation5 + $0x20] ss:$12 sps:$4 sm:$0xff]   ;;  %vm1470_vm0 = vmmov 0   ;;  %v155_v30 = vshrl.u32 %v117_v29, 7 }
  0x47   :  { %1142 = vmatprep.subr.bf16.mxu1 %v1469_v1  ;;  %v116_v26 = vpack.c.bf16 %v1575_v24, %v1573_v23  ;;  %v1288_v28 = vld [vmem:[#allocation5 + $0x8] ss:$12 sps:$4 sm:$0xff]   ;;  %1154 = vmatprep.mubr.msk.bf16.mxu1 %vm1470_vm0, %v1469_v1  ;;  %v152_v32 = vld [vmem:[%s1680_s2] sm:$0x7]  ;;  %vm495_vm1 = vcmask 1043456   ;;  %vm467_vm2 = vcmask 64512  }
  0x48   :  { %v160_v31 = vsub.s32 1, %v155_v30  ;;  %v156_v34 = vsub.s32 0, %v155_v30  ;;  %v164_v48 = vsub.s32 2, %v155_v30  ;;  %s1471_s28 = smov [#allocation11]  }
  0x49   :  { %302 = vmatpush1.bf16.msra.mxu0 %v1265_v7  ;;  %s1023_s29 = sshll.u32 %s1471_s28, 4  ;;  %s1024_s29 = int_to_ptr.vmem [resolvable:$true] %s1023_s29 }
  0x4a   :  { %303 = vmatprep.subr.bf16.mxu0 %v1266_v8  ;;  %1143 = vmatpush3.bf16.msra.mxu1 %v1283_v15  ;;  %v161_v33 = vrot.slane %v152_v32, %v160_v31  ;;  %v157_v38 = vrot.slane %v152_v32, %v156_v34  ;;  %v165_v49 = vrot.slane %v152_v32, %v164_v48  ;;  %v1295_v34 = vld [vmem:[#allocation7 + $0x8] sm:$0xff]   ;;  %s1429_s7 = scalar_lea.vmem %s1024_s29, 256  ;;  %p1434_p12 = scmp.lt.s32.totalorder %s1024_s29, %s1024_s29 }
  0x4b   :  { %1144 = vmatprep.subr.bf16.mxu1 %v1469_v1  ;;  %p1430_p11 = scmp.ne.s32.totalorder %s1024_s29, %s1429_s7  ;;  %p1435_p13 = scmp.lt.s32.totalorder %s1429_s7, %s1429_s7 }
  0x4d   :  { %304 = vmatpush1.bf16.msra.mxu0 %v1268_v9  ;;  %p1436_p0 = por %p1435_p13, %p1434_p12 }
  0x4e   :  { %305 = vmatprep.subr.bf16.mxu0 %v1269_v10  ;;  %1145 = vmatpush3.bf16.msra.mxu1 %v1284_v18  ;;  %v1290_v18 = vld [vmem:[#allocation7 + $0x30] sm:$0xff]  }
  0x4f   :  { %1146 = vmatprep.subr.bf16.mxu1 %v1469_v1  ;;  %p1437_p1 = pnand %p1436_p0, %p1430_p11 }
  0x51   :  { %306 = vmatpush1.bf16.msra.mxu0 %v1271_v13 }
  0x52   :  { %307 = vmatprep.subr.bf16.mxu0 %v1272_v14  ;;  %1147 = vmatpush3.bf16.msra.mxu1 %v1285_v21  ;;  %v1293_v21 = vld [vmem:[#allocation7 + $0x18] sm:$0xff]  }
  0x53   :  { %1148 = vmatprep.subr.bf16.mxu1 %v1469_v1 }
  0x55   :  { %308 = vmatpush1.bf16.msra.mxu0 %v1274_v16 }
  0x56   :  { %309 = vmatprep.subr.bf16.mxu0 %v1275_v17  ;;  %1149 = vmatpush3.bf16.msra.mxu1 %v1286_v25  ;;  %v1289_v17 = vld [vmem:[#allocation7 + $0x38] sm:$0xff]  }
  0x57   :  { %1150 = vmatprep.subr.bf16.mxu1 %v1469_v1 }
  0x59   :  { %310 = vmatpush1.bf16.msra.mxu0 %v1277_v19  ;;  %v1291_v19 = vld [vmem:[#allocation7 + $0x28] sm:$0xff]  }
  0x5a   :  { %311 = vmatprep.subr.bf16.mxu0 %v1278_v20  ;;  %1151 = vmatpush3.bf16.msra.mxu1 %v1287_v27  ;;  %v1292_v20 = vld [vmem:[#allocation7 + $0x20] sm:$0xff]  }
  0x5b   :  { %1152 = vmatprep.subr.bf16.mxu1 %v1469_v1 }
  0x5d   :  { %312 = vmatpush1.bf16.msra.mxu0 %v1280_v22 }
  0x5e   :  { %1182 = vmatprep.subr.bf16.mxu0 %v1469_v1  ;;  %1153 = vmatpush3.bf16.msra.mxu1 %v1288_v28 }
  0x5f   :  { %1158 = vmatprep.subr.bf16.mxu1 %v1469_v1 }
  0x60   :  { %330 = vmatmul.mubr.bf16.vlgmr.msra.gmra.mxu0 %v116_v26 }
  0x61   :  { %1198 = vmatprep.mubr.msk.bf16.mxu0 %vm1470_vm0, %v1469_v1  ;;  %1155 = vmatmul.mubr.bf16.vlgmr.msra.gmra.mxu1 %v116_v26 }
  0x62   :  { %1160 = vmatprep.mubr.msk.bf16.mxu1 %vm1470_vm0, %v1469_v1  ;;  %1183 = vmatpush3.bf16.msra.mxu0 %v1289_v17 }
  0x63   :  { %1184 = vmatprep.subr.bf16.mxu0 %v1469_v1 }
  0x66   :  { %1185 = vmatpush3.bf16.msra.mxu0 %v1290_v18 }
  0x67   :  { %1186 = vmatprep.subr.bf16.mxu0 %v1469_v1 }
  0x6a   :  { %1187 = vmatpush3.bf16.msra.mxu0 %v1291_v19 }
  0x6b   :  { %1188 = vmatprep.subr.bf16.mxu0 %v1469_v1 }
  0x6e   :  { %1189 = vmatpush3.bf16.msra.mxu0 %v1292_v20  ;;  %v1072_v20 = vld [vmem:[%s1683_s5] ss:$0 sm:$0xff] }
  0x6f   :  { %1190 = vmatprep.subr.bf16.mxu0 %v1469_v1 }
  0x72   :  { %1191 = vmatpush3.bf16.msra.mxu0 %v1293_v21 }
  0x73   :  { %1192 = vmatprep.subr.bf16.mxu0 %v1469_v1 }
 0x120   :  { %v331_v35 = vpop.f32.mrf.mxu0 }
 0x121   :  { %v332_v42 = vadd.f32 %v331_v35, %v157_v38  ;;  %v374_v50 = vpop.f32.mrf.mxu1  ;;  %v1296_v35 = vld [vmem:[#allocation7] sm:$0xff]  }
 0x122   :  { %v333_v36 = vpop.f32.mrf.mxu0  ;;  %v375_v51 = vadd.f32 %v374_v50, %v165_v49 }
 0x123   :  { %v334_v37 = vadd.f32 %v333_v36, %v161_v33  ;;  %v381_v44 = vpack.c.bf16 %v332_v42, %v332_v42  ;;  %v1156_v52 = vpop.f32.mrf.mxu1 }
 0x124   :  { %v335_v39 = vpop.f32.mrf.mxu0  ;;  %v385_v53 = vpack.c.bf16 %v375_v51, %v375_v51 }
 0x125   :  { %v383_v40 = vpack.c.bf16 %v334_v37, %v334_v37  ;;  %v336_v46 = vadd.f32 %v335_v39, %v157_v38  ;;  %v377_v54 = vpop.f32.mrf.mxu1 }
 0x126   :  { %v337_v41 = vpop.f32.mrf.mxu0  ;;  %v497_v55 = vsel %vm495_vm1, %v385_v53, 0  ;;  %v378_v56 = vadd.f32 %v377_v54, %v165_v49  ;;  %v1297_v54 = vld [vmem:[#allocation8 + $0x38] sm:$0xff]  }
 0x127   :  { %1159 = vmatpush3.bf16.xpose.msra.mxu1 %v383_v40  ;;  %v338_v43 = vadd.f32 %v337_v41, %v161_v33  ;;  %v382_v47 = vpack.c.bf16 %v336_v46, %v336_v46  ;;  %v1157_v57 = vpop.f32.mrf.mxu1  ;;  %v1294_v33 = vld [vmem:[#allocation7 + $0x10] sm:$0xff]  }
 0x128   :  { %1164 = vmatprep.subr.bf16.mxu1 %v1469_v1  ;;  %v386_v58 = vpack.c.bf16 %v378_v56, %v378_v56  ;;  %1193 = vmatpush3.bf16.msra.mxu0 %v1294_v33  ;;  %v1311_v33 = vld [vmem:[#allocation10 + $0x8] sm:$0xff]  }
 0x129   :  { %v384_v45 = vpack.c.bf16 %v338_v43, %v338_v43  ;;  %1194 = vmatprep.subr.bf16.mxu0 %v1469_v1 }
 0x12a   :  { %v543_v59 = vsel %vm495_vm1, %v386_v58, 0 }
 0x12c   :  { %1195 = vmatpush3.bf16.msra.mxu0 %v1295_v34  ;;  %v1312_v34 = vld [vmem:[#allocation10] sm:$0xff]  }
 0x12d   :  { %1196 = vmatprep.subr.bf16.mxu0 %v1469_v1 }
 0x12e   :  { %1161 = vmatmul.mubr.bf16.vlgmr.msra.gmra.mxu1 %v381_v44 }
 0x12f   :  { %1165 = vmatpush3.bf16.xpose.msra.mxu1 %v384_v45  ;;  %1166 = vmatprep.mubr.msk.bf16.mxu1 %vm1470_vm0, %v1469_v1  ;;  %v1063_v45 = vld [vmem:[%s1682_s4] ss:$0 sm:$0xff] }
 0x130   :  { %1170 = vmatprep.subr.bf16.mxu1 %v1469_v1  ;;  %1197 = vmatpush3.bf16.msra.mxu0 %v1296_v35  ;;  %v1074_v35 = vld [vmem:[%s1686_s8] ss:$0 sm:$0xff] }
 0x131   :  { %1222 = vmatprep.subr.bf16.mxu0 %v1469_v1 }
 0x136   :  { %1167 = vmatmul.mubr.bf16.vlgmr.msra.gmra.mxu1 %v382_v47 }
 0x137   :  { %1172 = vmatprep.mubr.msk.bf16.mxu1 %vm1470_vm0, %v1469_v1  ;;  %1171 = vmatpush3.bf16.msra.mxu1 %v497_v55  ;;  %v1630_v55 = vand.u32 127, %v117_v29  ;;  %v1298_v29 = vld [vmem:[#allocation8 + $0x30] sm:$0xff]  }
 0x138   :  { %1176 = vmatprep.subr.bf16.mxu1 %v1469_v1 }
 0x139   :  { %vm119_vm3 = vcmp.lt.s32.totalorder %v1630_v55, 32  ;;  %v1093_v55 = vld [vmem:[%s1690_s12] ss:$0 sm:$0xff] }
 0x1ee   :  { %v421_v60 = vpop.f32.mrf.mxu1 }
 0x1ef   :  { %v468_v61 = vsel %vm467_vm2, %v421_v60, -inf }
 0x1f0   :  { %469 = vmax.xlane.f32.xlu0 %v468_v61  ;;  %v1162_v62 = vpop.f32.mrf.mxu1 }
 0x1f2   :  { %v424_v63 = vpop.f32.mrf.mxu1 }
 0x1f4   :  { %v1163_v0 = vpop.f32.mrf.mxu1 }
 0x1f5   :  { %v1299_v0 = vld [vmem:[#allocation8 + $0x28] sm:$0xff]  }
 0x1f6   :  { %v461_v2 = vpop.f32.mrf.mxu1 }
 0x1f7   :  { %v471_v3 = vsel %vm467_vm2, %v461_v2, -inf }
 0x1f8   :  { %472 = vmax.xlane.f32.xlu0 %v471_v3  ;;  %v1168_v4 = vpop.f32.mrf.mxu1  ;;  %v1301_v3 = vld [vmem:[#allocation8 + $0x18] sm:$0xff]  }
 0x1f9   :  { %v1302_v4 = vld [vmem:[#allocation8 + $0x10] sm:$0xff]  }
 0x1fa   :  { %v464_v5 = vpop.f32.mrf.mxu1 }
 0x1fb   :  { %v1303_v5 = vld [vmem:[#allocation8 + $0x8] sm:$0xff]  }
 0x1fc   :  { %v1169_v6 = vpop.f32.mrf.mxu1 }
 0x1fd   :  { %v1304_v6 = vld [vmem:[#allocation8] sm:$0xff]  }
 0x279   :  { %v470_v7 = vpop.xlane.xlu0 %469 }
 0x27a   :  { %v474_v8 = vsub.f32 %v421_v60, %v470_v7  ;;  %v1305_v7 = vld [vmem:[#allocation10 + $0x38] sm:$0xff]  }
 0x27c   :  { %v476_v9 = vmul.f32 1.442695, %v474_v8  ;;  %v1306_v8 = vld [vmem:[#allocation10 + $0x30] sm:$0xff]  }
 0x27e   :  { %1313 = vpow2.f32 %v476_v9  ;;  %v1307_v9 = vld [vmem:[#allocation10 + $0x28] sm:$0xff]  }
 0x281   :  { %v473_v10 = vpop.xlane.xlu0 %472 }
 0x282   :  { %v475_v11 = vsub.f32 %v461_v2, %v473_v10  ;;  %v1300_v2 = vld [vmem:[#allocation8 + $0x20] sm:$0xff]  }
 0x283   :  { %v1308_v10 = vld [vmem:[#allocation10 + $0x20] sm:$0xff]  }
 0x284   :  { %v478_v12 = vmul.f32 1.442695, %v475_v11  ;;  %v1309_v11 = vld [vmem:[#allocation10 + $0x18] sm:$0xff]  }
 0x286   :  { %1315 = vpow2.f32 %v478_v12 }
 0x28b   :  { %v1314_v13 = vpop.eup %1313 }
 0x28c   :  { %v480_v14 = vsel %vm467_vm2, %v1314_v13, 0.0 }
 0x28d   :  { %481 = vadd.xlane.f32.xlu1 %v480_v14 }
 0x293   :  { %v1316_v15 = vpop.eup %1315 }
 0x294   :  { %v483_v16 = vsel %vm467_vm2, %v1316_v15, 0.0 }
 0x295   :  { %484 = vadd.xlane.f32.xlu1 %v483_v16 }
 0x316   :  { %v482_v22 = vpop.xlane.xlu1 %481 }
 0x317   :  { %1317 = vrcp.f32 %v482_v22 }
 0x31e   :  { %v485_v25 = vpop.xlane.xlu1 %484 }
 0x31f   :  { %1319 = vrcp.f32 %v485_v25 }
 0x324   :  { %v1318_v26 = vpop.eup %1317 }
 0x325   :  { %v488_v27 = vmul.f32 %v1318_v26, %v1314_v13  ;;  %v1073_v26 = vld [vmem:[%s1684_s6] ss:$0 sm:$0xff] }
 0x327   :  { %v490_v28 = vpack.c.bf16 %v488_v27, %v488_v27 }
 0x329   :  { %1173 = vmatmul.mubr.msk.bf16.vlgmr.msra.gmra.mxu1 %vm467_vm2, %v490_v28 }
 0x32a   :  { %1177 = vmatpush3.bf16.msra.mxu1 %v543_v59  ;;  %1178 = vmatprep.mubr.msk.bf16.mxu1 %vm1470_vm0, %v1469_v1 }
 0x32b   :  { %1202 = vmatprep.subr.bf16.mxu1 %v1469_v1 }
 0x32c   :  { %v1320_v30 = vpop.eup %1319 }
 0x32d   :  { %v489_v31 = vmul.f32 %v1320_v30, %v1316_v15 }
 0x32f   :  { %v491_v32 = vpack.c.bf16 %v489_v31, %v489_v31 }
 0x331   :  { %1179 = vmatmul.mubr.msk.bf16.vlgmr.msra.gmra.mxu1 %vm467_vm2, %v491_v32  ;;  %v1310_v32 = vld [vmem:[#allocation10 + $0x10] sm:$0xff]  }
 0x332   :  { %1218 = vmatprep.mubr.msk.bf16.mxu1 %vm1470_vm0, %v1469_v1  ;;  %1203 = vmatpush3.bf16.msra.mxu1 %v1297_v54 }
 0x333   :  { %1204 = vmatprep.subr.bf16.mxu1 %v1469_v1 }
 0x336   :  { %1205 = vmatpush3.bf16.msra.mxu1 %v1298_v29 }
 0x337   :  { %1206 = vmatprep.subr.bf16.mxu1 %v1469_v1 }
 0x33a   :  { %1207 = vmatpush3.bf16.msra.mxu1 %v1299_v0 }
 0x33b   :  { %1208 = vmatprep.subr.bf16.mxu1 %v1469_v1 }
 0x33e   :  { %1209 = vmatpush3.bf16.msra.mxu1 %v1300_v2 }
 0x33f   :  { %1210 = vmatprep.subr.bf16.mxu1 %v1469_v1 }
 0x342   :  { %1211 = vmatpush3.bf16.msra.mxu1 %v1301_v3 }
 0x343   :  { %1212 = vmatprep.subr.bf16.mxu1 %v1469_v1 }
 0x346   :  { %1213 = vmatpush3.bf16.msra.mxu1 %v1302_v4 }
 0x347   :  { %1214 = vmatprep.subr.bf16.mxu1 %v1469_v1 }
 0x34a   :  { %1215 = vmatpush3.bf16.msra.mxu1 %v1303_v5  ;;  %v1092_v5 = vld [vmem:[%s1689_s11] ss:$0 sm:$0xff] }
 0x34b   :  { %1216 = vmatprep.subr.bf16.mxu1 %v1469_v1 }
 0x34e   :  { %1217 = vmatpush3.bf16.msra.mxu1 %v1304_v6 }
 0x3e9   :  { %v533_v36 = vpop.f32.mrf.mxu1 }
 0x3eb   :  { %v1174_v37 = vpop.f32.mrf.mxu1 }
 0x3ed   :  { %v536_v38 = vpop.f32.mrf.mxu1 }
 0x3ef   :  { %v1175_v39 = vpop.f32.mrf.mxu1 }
 0x3f1   :  { %v579_v40 = vpop.f32.mrf.mxu1 }
 0x3f2   :  { %v585_v41 = vpack.c.bf16 %v579_v40, %v533_v36 }
 0x3f3   :  { %v1180_v42 = vpop.f32.mrf.mxu1 }
 0x3f4   :  { %1199 = vmatmul.mubr.bf16.vlgmr.msra.gmra.mxu0 %v585_v41 }
 0x3f5   :  { %v582_v43 = vpop.f32.mrf.mxu1  ;;  %1238 = vmatprep.mubr.msk.bf16.mxu0 %vm1470_vm0, %v1469_v1  ;;  %1223 = vmatpush3.bf16.msra.mxu0 %v1305_v7 }
 0x3f6   :  { %1224 = vmatprep.subr.bf16.mxu0 %v1469_v1 }
 0x3f7   :  { %v1181_v44 = vpop.f32.mrf.mxu1 }
 0x3f9   :  { %1225 = vmatpush3.bf16.msra.mxu0 %v1306_v8 }
 0x3fa   :  { %1226 = vmatprep.subr.bf16.mxu0 %v1469_v1 }
 0x3fd   :  { %1227 = vmatpush3.bf16.msra.mxu0 %v1307_v9 }
 0x3fe   :  { %1228 = vmatprep.subr.bf16.mxu0 %v1469_v1 }
 0x401   :  { %1229 = vmatpush3.bf16.msra.mxu0 %v1308_v10 }
 0x402   :  { %1230 = vmatprep.subr.bf16.mxu0 %v1469_v1 }
 0x405   :  { %1231 = vmatpush3.bf16.msra.mxu0 %v1309_v11 }
 0x406   :  { %1232 = vmatprep.subr.bf16.mxu0 %v1469_v1 }
 0x409   :  { %1233 = vmatpush3.bf16.msra.mxu0 %v1310_v32 }
 0x40a   :  { %1234 = vmatprep.subr.bf16.mxu0 %v1469_v1 }
 0x40d   :  { %1235 = vmatpush3.bf16.msra.mxu0 %v1311_v33 }
 0x40e   :  { %1236 = vmatprep.subr.bf16.mxu0 %v1469_v1  ;;  %v1083_v1 = vld [vmem:[%s1688_s10] ss:$0 sm:$0xff] }
 0x411   :  { %1237 = vmatpush3.bf16.msra.mxu0 %v1312_v34 }
 0x4b4   :  { %v691_v46 = vpop.f32.mrf.mxu0 }
 0x4b5   :  { %v692_v47 = vadd.f32 %v1063_v45, %v691_v46 }
 0x4b6   :  { %v1200_v48 = vpop.f32.mrf.mxu0 }
 0x4b7   :  { %v698_v49 = vadd.f32 %v692_v47, %v1573_v23 }
 0x4b8   :  { %v694_v50 = vpop.f32.mrf.mxu0 }
 0x4b9   :  { %v695_v51 = vadd.f32 %v1063_v45, %v694_v50  ;;  %702 = vadd.xlane.f32.xlu0 %v698_v49 }
 0x4ba   :  { %v1201_v52 = vpop.f32.mrf.mxu0 }
 0x4bb   :  { %v699_v53 = vadd.f32 %v695_v51, %v1575_v24 }
 0x4bd   :  { %704 = vadd.xlane.f32.xlu1 %v699_v53 }
 0x542   :  { %v703_v56 = vpop.xlane.xlu0 %702 }
 0x543   :  { %v706_v57 = vmul.f32 0.03125, %v703_v56 }
 0x545   :  { %v708_v58 = vsub.f32 %v698_v49, %v706_v57 }
 0x546   :  { %v705_v23 = vpop.xlane.xlu1 %704 }
 0x547   :  { %v707_v59 = vmul.f32 0.03125, %v705_v23  ;;  %v712_v60 = vsel %vm119_vm3, %v708_v58, 0.0 }
 0x548   :  { %v714_v61 = vmul.f32 %v712_v60, %v712_v60 }
 0x549   :  { %v709_v24 = vsub.f32 %v699_v53, %v707_v59 }
 0x54a   :  { %716 = vadd.xlane.f32.xlu0 %v714_v61 }
 0x54b   :  { %v713_v62 = vsel %vm119_vm3, %v709_v24, 0.0 }
 0x54c   :  { %v715_v63 = vmul.f32 %v713_v62, %v713_v62 }
 0x54e   :  { %718 = vadd.xlane.f32.xlu1 %v715_v63 }
 0x5d3   :  { %v717_v12 = vpop.xlane.xlu0 %716 }
 0x5d4   :  { %v720_v13 = vmul.f32 0.03125, %v717_v12 }
 0x5d6   :  { %v722_v14 = vadd.f32 1e-05, %v720_v13 }
 0x5d7   :  { %v719_v15 = vpop.xlane.xlu1 %718 }
 0x5d8   :  { %1321 = vrsqrt.f32 %v722_v14  ;;  %v721_v16 = vmul.f32 0.03125, %v719_v15 }
 0x5da   :  { %v723_v17 = vadd.f32 1e-05, %v721_v16 }
 0x5dc   :  { %1323 = vrsqrt.f32 %v723_v17 }
 0x5e5   :  { %v1322_v18 = vpop.eup %1321 }
 0x5e6   :  { %v726_v19 = vmul.f32 %v1322_v18, %v712_v60 }
 0x5e8   :  { %v734_v25 = vmul.f32 %v1072_v20, %v726_v19 }
 0x5e9   :  { %v1324_v21 = vpop.eup %1323 }
 0x5ea   :  { %v727_v22 = vmul.f32 %v1324_v21, %v713_v62  ;;  %v742_v28 = vadd.f32 %v1073_v26, %v734_v25 }
 0x5ec   :  { %v735_v27 = vmul.f32 %v1072_v20, %v727_v22 }
 0x5ee   :  { %v743_v30 = vadd.f32 %v1073_v26, %v735_v27 }
 0x5f0   :  { %v744_v31 = vpack.c.bf16 %v743_v30, %v742_v28 }
 0x5f2   :  { %1219 = vmatmul.mubr.bf16.vlgmr.msra.gmra.mxu1 %v744_v31 }
 0x6b2   :  { %v850_v36 = vpop.f32.mrf.mxu1 }
 0x6b3   :  { %v851_v38 = vadd.f32 %v1074_v35, %v850_v36 }
 0x6b4   :  { %v1220_v37 = vpop.f32.mrf.mxu1 }
 0x6b5   :  { %v857_v42 = vmax.f32 %v851_v38, 0.0 }
 0x6b6   :  { %v853_v39 = vpop.f32.mrf.mxu1 }
 0x6b7   :  { %v854_v40 = vadd.f32 %v1074_v35, %v853_v39 }
 0x6b8   :  { %v1221_v41 = vpop.f32.mrf.mxu1 }
 0x6b9   :  { %v858_v43 = vmax.f32 %v854_v40, 0.0 }
 0x6bb   :  { %v859_v44 = vpack.c.bf16 %v858_v43, %v857_v42 }
 0x6bd   :  { %1239 = vmatmul.mubr.bf16.vlgmr.msra.gmra.mxu0 %v859_v44 }
 0x77d   :  { %v965_v45 = vpop.f32.mrf.mxu0 }
 0x77e   :  { %v966_v46 = vadd.f32 %v1083_v1, %v965_v45 }
 0x77f   :  { %v1240_v47 = vpop.f32.mrf.mxu0 }
 0x780   :  { %v972_v48 = vadd.f32 %v966_v46, %v742_v28 }
 0x781   :  { %v968_v49 = vpop.f32.mrf.mxu0 }
 0x782   :  { %v969_v50 = vadd.f32 %v1083_v1, %v968_v49  ;;  %976 = vadd.xlane.f32.xlu0 %v972_v48 }
 0x783   :  { %v1241_v51 = vpop.f32.mrf.mxu0 }
 0x784   :  { %v973_v52 = vadd.f32 %v969_v50, %v743_v30 }
 0x786   :  { %978 = vadd.xlane.f32.xlu1 %v973_v52 }
 0x80b   :  { %v977_v53 = vpop.xlane.xlu0 %976 }
 0x80c   :  { %v980_v54 = vmul.f32 0.03125, %v977_v53 }
 0x80e   :  { %v982_v56 = vsub.f32 %v972_v48, %v980_v54 }
 0x80f   :  { %v979_v57 = vpop.xlane.xlu1 %978 }
 0x810   :  { %v981_v58 = vmul.f32 0.03125, %v979_v57  ;;  %v984_v23 = vsel %vm119_vm3, %v982_v56, 0.0 }
 0x811   :  { %v986_v59 = vmul.f32 %v984_v23, %v984_v23 }
 0x812   :  { %v983_v60 = vsub.f32 %v973_v52, %v981_v58 }
 0x813   :  { %988 = vadd.xlane.f32.xlu0 %v986_v59 }
 0x814   :  { %v985_v61 = vsel %vm119_vm3, %v983_v60, 0.0 }
 0x815   :  { %v987_v24 = vmul.f32 %v985_v61, %v985_v61 }
 0x817   :  { %990 = vadd.xlane.f32.xlu1 %v987_v24 }
 0x89c   :  { %v989_v62 = vpop.xlane.xlu0 %988 }
 0x89d   :  { %v992_v63 = vmul.f32 0.03125, %v989_v62 }
 0x89f   :  { %v994_v29 = vadd.f32 1e-05, %v992_v63 }
 0x8a0   :  { %v991_v0 = vpop.xlane.xlu1 %990 }
 0x8a1   :  { %1325 = vrsqrt.f32 %v994_v29  ;;  %v993_v2 = vmul.f32 0.03125, %v991_v0 }
 0x8a3   :  { %v995_v3 = vadd.f32 1e-05, %v993_v2 }
 0x8a5   :  { %1327 = vrsqrt.f32 %v995_v3 }
 0x8ae   :  { %v1326_v4 = vpop.eup %1325 }
 0x8af   :  { %v998_v6 = vmul.f32 %v1326_v4, %v984_v23 }
 0x8b1   :  { %v1006_v7 = vmul.f32 %v1092_v5, %v998_v6 }
 0x8b2   :  { %v1328_v8 = vpop.eup %1327 }
 0x8b3   :  { %v999_v9 = vmul.f32 %v1328_v8, %v985_v61  ;;  %v1014_v10 = vadd.f32 %v1093_v55, %v1006_v7 }
 0x8b5   :  { %v1007_v11 = vmul.f32 %v1092_v5, %v999_v9  ;;  %1016 = vst [vmem:[#allocation11] sm:$0xff] %v1014_v10 }
 0x8b7   :  { %v1015_v12 = vadd.f32 %v1093_v55, %v1007_v11 }
 0x8b9   :  { %1017 = vst [vmem:[#allocation11 + $0x8] sm:$0xff] %v1015_v12 }
 0x8ba   :  { %1440 = shalt.err (!%p1437_p1)
}
 0x8bb   :  { %1029 = dma.vmem_to_hbm [thread:$0]  %s1024_s29, 256, %s1691_s13, [#allocation4], %s1464_s24, %s1464_s24, %s1465_s25  }
 0x8bc   :  { %1455 = dma.done.wait [#allocation4], 256  }
 0x8bd   :  { %1456 = vsyncadd [#allocation4], 4294967040 }
 0x8be   :  { %1033 = vsyncpa [#allocation3], 1 }
 0x8bf   :  { %1034 = vsyncpa [#allocation6], 1 }
 0x8c0   :  { %1035 = vsyncpa [#allocation9], 1 }
 0x8c1   :  { %1036 = vsyncpa [#allocation4], 1 }

// kernel: tpu_custom_call.1
= control target key start
LH: loop header
LB: loop body
LE: loop exit
PB: predicated region body
PF: predicated region fallthrough
CT: control target
= control target key end

     0   :  { %18 = vsyncpa [#allocation3], 0  ;;  %s1678_s0 = inlined_call_operand.hbm [shape: f32[2,8,128], index: 0, kind: input, shape index: {}]   ;;  %s1679_s1 = inlined_call_operand.hbm [shape: bf16[128,384], index: 1, kind: input, shape index: {}]   ;;  %s1680_s2 = inlined_call_operand.vmem [shape: f32[1,384], index: 2, kind: input, shape index: {}]   ;;  %s1681_s3 = inlined_call_operand.hbm [shape: bf16[128,128], index: 3, kind: input, shape index: {}]   ;;  %s1682_s4 = inlined_call_operand.vmem [shape: f32[1,128], index: 4, kind: input, shape index: {}]   ;;  %s1683_s5 = inlined_call_operand.vmem [shape: f32[1,128], index: 5, kind: input, shape index: {}]   ;;  %s1684_s6 = inlined_call_operand.vmem [shape: f32[1,128], index: 6, kind: input, shape index: {}]   ;;  %s1685_s7 = inlined_call_operand.hbm [shape: bf16[128,128], index: 7, kind: input, shape index: {}]   ;;  %s1686_s8 = inlined_call_operand.vmem [shape: f32[1,128], index: 8, kind: input, shape index: {}]   ;;  %s1687_s9 = inlined_call_operand.hbm [shape: bf16[128,128], index: 9, kind: input, shape index: {}]   ;;  %s1688_s10 = inlined_call_operand.vmem [shape: f32[1,128], index: 10, kind: input, shape index: {}]   ;;  %s1689_s11 = inlined_call_operand.vmem [shape: f32[1,128], index: 11, kind: input, shape index: {}]   ;;  %s1690_s12 = inlined_call_operand.vmem [shape: f32[1,128], index: 12, kind: input, shape index: {}]   ;;  %s1691_s13 = inlined_call_operand.hbm [shape: f32[2,8,128], index: 13, kind: output, shape index: {}]  }
   0x1   :  { %19 = vsyncpa [#allocation6], 0 }
   0x2   :  { %20 = vsyncpa [#allocation9], 0 }
   0x3   :  { %21 = vsyncpa [#allocation4], 0  ;;  %s1457_s25 = smov [#allocation5]  }
   0x4   :  { %s39_s26 = sshll.u32 %s1457_s25, 4  ;;  %s40_s26 = int_to_ptr.vmem [resolvable:$true] %s39_s26 }
   0x5   :  { %s1337_s27 = scalar_lea.vmem %s40_s26, 3072  ;;  %p1342_p1 = scmp.lt.s32.totalorder %s40_s26, %s40_s26 }
   0x6   :  { %p1338_p0 = scmp.ne.s32.totalorder %s40_s26, %s1337_s27  ;;  %p1343_p2 = scmp.lt.s32.totalorder %s1337_s27, %s1337_s27 }
   0x8   :  { %p1344_p3 = por %p1343_p2, %p1342_p1 }
   0xa   :  { %p1345_p4 = pnand %p1344_p3, %p1338_p0 }
   0xc   :  { %1348 = shalt.err (!%p1345_p4)
}
   0xd   :  { %s1458_s28 = smov 192   ;;  %s1459_s29 = smov 12  }
   0xe   :  { %45 = dma.hbm_to_vmem [thread:$0]  %s1679_s1, 3072, %s40_s26, [#allocation6], %s1458_s28, %s1458_s28, %s1459_s29  }
   0xf   :  { %s1460_s15 = smov [#allocation8]   ;;  %s1461_s17 = smov [#allocation2]  }
  0x10   :  { %s71_s16 = sshll.u32 %s1460_s15, 4  ;;  %s27_s18 = sshll.u32 %s1461_s17, 4  ;;  %s72_s16 = int_to_ptr.vmem [resolvable:$true] %s71_s16  ;;  %s28_s18 = int_to_ptr.vmem [resolvable:$true] %s27_s18 }
  0x11   :  { %s1357_s19 = scalar_lea.vmem %s72_s16, 1024  ;;  %p1362_p6 = scmp.lt.s32.totalorder %s72_s16, %s72_s16 }
  0x12   :  { %p1358_p5 = scmp.ne.s32.totalorder %s72_s16, %s1357_s19  ;;  %p1363_p7 = scmp.lt.s32.totalorder %s1357_s19, %s1357_s19 }
  0x14   :  { %p1364_p8 = por %p1363_p7, %p1362_p6 }
  0x16   :  { %p1365_p9 = pnand %p1364_p8, %p1358_p5 }
  0x18   :  { %1368 = shalt.err (!%p1365_p9)
}
  0x19   :  { %s1462_s20 = smov 64   ;;  %s1463_s21 = smov 4  }
  0x1a   :  { %77 = dma.hbm_to_vmem [thread:$0]  %s1685_s7, 1024, %s72_s16, [#allocation9], %s1462_s20, %s1462_s20, %s1463_s21  }
  0x1b   :  { %s1377_s1 = scalar_lea.vmem %s28_s18, 256  ;;  %p1382_p11 = scmp.lt.s32.totalorder %s28_s18, %s28_s18 }
  0x1c   :  { %p1378_p10 = scmp.ne.s32.totalorder %s28_s18, %s1377_s1  ;;  %p1383_p12 = scmp.lt.s32.totalorder %s1377_s1, %s1377_s1 }
  0x1e   :  { %p1384_p13 = por %p1383_p12, %p1382_p11 }
  0x20   :  { %p1385_p0 = pnand %p1384_p13, %p1378_p10 }
  0x22   :  { %1388 = shalt.err (!%p1385_p0)
}
  0x23   :  { %s1464_s24 = smov 128   ;;  %s1465_s25 = smov 8  }
  0x24   :  { %33 = dma.hbm_to_vmem [thread:$0]  %s1678_s0, 256, %s28_s18, [#allocation3], %s1464_s24, %s1464_s24, %s1465_s25  }
  0x25   :  { %s1466_s28 = smov [#allocation7]   ;;  %s1467_s7 = smov [#allocation10]  }
  0x26   :  { %s53_s29 = sshll.u32 %s1466_s28, 4  ;;  %s85_s30 = sshll.u32 %s1467_s7, 4  ;;  %s54_s29 = int_to_ptr.vmem [resolvable:$true] %s53_s29  ;;  %s86_s30 = int_to_ptr.vmem [resolvable:$true] %s85_s30 }
  0x27   :  { %s1397_s14 = scalar_lea.vmem %s54_s29, 1024  ;;  %p1402_p2 = scmp.lt.s32.totalorder %s54_s29, %s54_s29 }
  0x28   :  { %p1398_p1 = scmp.ne.s32.totalorder %s54_s29, %s1397_s14  ;;  %p1403_p3 = scmp.lt.s32.totalorder %s1397_s14, %s1397_s14 }
  0x2a   :  { %p1404_p4 = por %p1403_p3, %p1402_p2 }
  0x2c   :  { %p1405_p5 = pnand %p1404_p4, %p1398_p1 }
  0x2e   :  { %1408 = shalt.err (!%p1405_p5)
}
  0x2f   :  { %59 = dma.hbm_to_vmem [thread:$0]  %s1681_s3, 1024, %s54_s29, [#allocation6], %s1462_s20, %s1462_s20, %s1463_s21  }
  0x30   :  { %s1417_s0 = scalar_lea.vmem %s86_s30, 1024  ;;  %p1422_p7 = scmp.lt.s32.totalorder %s86_s30, %s86_s30 }
  0x31   :  { %p1418_p6 = scmp.ne.s32.totalorder %s86_s30, %s1417_s0  ;;  %p1423_p8 = scmp.lt.s32.totalorder %s1417_s0, %s1417_s0 }
  0x33   :  { %p1424_p9 = por %p1423_p8, %p1422_p7 }
  0x35   :  { %p1425_p10 = pnand %p1424_p9, %p1418_p6 }
  0x37   :  { %1428 = shalt.err (!%p1425_p10)
}
  0x38   :  { %91 = dma.hbm_to_vmem [thread:$0]  %s1687_s9, 1024, %s86_s30, [#allocation9], %s1462_s20, %s1462_s20, %s1463_s21  }
  0x39   :  { %1449 = dma.done.wait [#allocation3], 256  }
  0x3a   :  { %1450 = vsyncadd [#allocation3], 4294967040 }
  0x3b   :  { %1451 = dma.done.wait [#allocation6], 4096  }
  0x3c   :  { %1452 = vsyncadd [#allocation6], 4294963200 }
  0x3d   :  { %1453 = dma.done.wait [#allocation9], 2048  }
  0x3e   :  { %1454 = vsyncadd [#allocation9], 4294965248  ;;  %v1468_v0 = vmov 0   ;;  %v1469_v1 = vmov 0.0   ;;  %v1257_v2 = vld [vmem:[#allocation5 + $0xac] ss:$12 sps:$4 sm:$0xff]   ;;  %v117_v29 = vlaneseq }
  0x3f   :  { %329 = vmatprep.mubr.bf16.mxu0 %v1468_v0  ;;  %1138 = vmatprep.subr.bf16.mxu1 %v1469_v1  ;;  %v1259_v3 = vld [vmem:[#allocation5 + $0xa8] ss:$12 sps:$4 sm:$0xff]   ;;  %v1262_v5 = vld [vmem:[#allocation5 + $0x90] ss:$12 sps:$4 sm:$0xff]   ;;  %v1265_v7 = vld [vmem:[#allocation5 + $0x78] ss:$12 sps:$4 sm:$0xff]  }
  0x40   :  { %297 = vmatprep.subr.bf16.mxu0 %v1257_v2  ;;  %v1260_v4 = vld [vmem:[#allocation5 + $0x94] ss:$12 sps:$4 sm:$0xff]   ;;  %v1263_v6 = vld [vmem:[#allocation5 + $0x7c] ss:$12 sps:$4 sm:$0xff]   ;;  %v1266_v8 = vld [vmem:[#allocation5 + $0x64] ss:$12 sps:$4 sm:$0xff]  }
  0x41   :  { %298 = vmatpush1.bf16.msra.mxu0 %v1259_v3  ;;  %v1268_v9 = vld [vmem:[#allocation5 + $0x60] ss:$12 sps:$4 sm:$0xff]   ;;  %v1281_v11 = vld [vmem:[#allocation5 + $0xb0] ss:$12 sps:$4 sm:$0xff]   ;;  %v1282_v12 = vld [vmem:[#allocation5 + $0x98] ss:$12 sps:$4 sm:$0xff]  }
  0x42   :  { %299 = vmatprep.subr.bf16.mxu0 %v1260_v4  ;;  %v1269_v10 = vld [vmem:[#allocation5 + $0x4c] ss:$12 sps:$4 sm:$0xff]   ;;  %1139 = vmatpush3.bf16.msra.mxu1 %v1281_v11  ;;  %v1271_v13 = vld [vmem:[#allocation5 + $0x48] ss:$12 sps:$4 sm:$0xff]   ;;  %v1274_v16 = vld [vmem:[#allocation5 + $0x30] ss:$12 sps:$4 sm:$0xff]  }
  0x43   :  { %1140 = vmatprep.subr.bf16.mxu1 %v1469_v1  ;;  %v1272_v14 = vld [vmem:[#allocation5 + $0x34] ss:$12 sps:$4 sm:$0xff]   ;;  %v1275_v17 = vld [vmem:[#allocation5 + $0x1c] ss:$12 sps:$4 sm:$0xff]   ;;  %v1277_v19 = vld [vmem:[#allocation5 + $0x18] ss:$12 sps:$4 sm:$0xff]  }
  0x44   :  { %v1283_v15 = vld [vmem:[#allocation5 + $0x80] ss:$12 sps:$4 sm:$0xff]   ;;  %v1284_v18 = vld [vmem:[#allocation5 + $0x68] ss:$12 sps:$4 sm:$0xff]   ;;  %v1278_v20 = vld [vmem:[#allocation5 + $0x4] ss:$12 sps:$4 sm:$0xff]  }
  0x45   :  { %300 = vmatpush1.bf16.msra.mxu0 %v1262_v5  ;;  %v1285_v21 = vld [vmem:[#allocation5 + $0x50] ss:$12 sps:$4 sm:$0xff]   ;;  %v1280_v22 = vld [vmem:[#allocation5] ss:$12 sps:$4 sm:$0xff]   ;;  %v1286_v25 = vld [vmem:[#allocation5 + $0x38] ss:$12 sps:$4 sm:$0xff]  }
  0x46   :  { %301 = vmatprep.subr.bf16.mxu0 %v1263_v6  ;;  %1141 = vmatpush3.bf16.msra.mxu1 %v1282_v12  ;;  %v1573_v23 = vld [vmem:[#allocation2] sm:$0xff]  ;;  %v1575_v24 = vld [vmem:[#allocation2 + $0x8] sm:$0xff]  ;;  %v1287_v27 = vld [vmem:[#allocation5 + $0x20] ss:$12 sps:$4 sm:$0xff]   ;;  %vm1470_vm0 = vmmov 0   ;;  %v155_v30 = vshrl.u32 %v117_v29, 7 }
  0x47   :  { %1142 = vmatprep.subr.bf16.mxu1 %v1469_v1  ;;  %v116_v26 = vpack.c.bf16 %v1575_v24, %v1573_v23  ;;  %v1288_v28 = vld [vmem:[#allocation5 + $0x8] ss:$12 sps:$4 sm:$0xff]   ;;  %1154 = vmatprep.mubr.msk.bf16.mxu1 %vm1470_vm0, %v1469_v1  ;;  %v152_v32 = vld [vmem:[%s1680_s2] sm:$0x7]  ;;  %vm495_vm1 = vcmask 1043456   ;;  %vm467_vm2 = vcmask 64512  }
  0x48   :  { %v160_v31 = vsub.s32 1, %v155_v30  ;;  %v156_v34 = vsub.s32 0, %v155_v30  ;;  %v164_v48 = vsub.s32 2, %v155_v30  ;;  %s1471_s28 = smov [#allocation11]  }
  0x49   :  { %302 = vmatpush1.bf16.msra.mxu0 %v1265_v7  ;;  %s1023_s29 = sshll.u32 %s1471_s28, 4  ;;  %s1024_s29 = int_to_ptr.vmem [resolvable:$true] %s1023_s29 }
  0x4a   :  { %303 = vmatprep.subr.bf16.mxu0 %v1266_v8  ;;  %1143 = vmatpush3.bf16.msra.mxu1 %v1283_v15  ;;  %v161_v33 = vrot.slane %v152_v32, %v160_v31  ;;  %v157_v38 = vrot.slane %v152_v32, %v156_v34  ;;  %v165_v49 = vrot.slane %v152_v32, %v164_v48  ;;  %v1295_v34 = vld [vmem:[#allocation7 + $0x8] sm:$0xff]   ;;  %s1429_s7 = scalar_lea.vmem %s1024_s29, 256  ;;  %p1434_p12 = scmp.lt.s32.totalorder %s1024_s29, %s1024_s29 }
  0x4b   :  { %1144 = vmatprep.subr.bf16.mxu1 %v1469_v1  ;;  %p1430_p11 = scmp.ne.s32.totalorder %s1024_s29, %s1429_s7  ;;  %p1435_p13 = scmp.lt.s32.totalorder %s1429_s7, %s1429_s7 }
  0x4d   :  { %304 = vmatpush1.bf16.msra.mxu0 %v1268_v9  ;;  %p1436_p0 = por %p1435_p13, %p1434_p12 }
  0x4e   :  { %305 = vmatprep.subr.bf16.mxu0 %v1269_v10  ;;  %1145 = vmatpush3.bf16.msra.mxu1 %v1284_v18  ;;  %v1290_v18 = vld [vmem:[#allocation7 + $0x30] sm:$0xff]  }
  0x4f   :  { %1146 = vmatprep.subr.bf16.mxu1 %v1469_v1  ;;  %p1437_p1 = pnand %p1436_p0, %p1430_p11 }
  0x51   :  { %306 = vmatpush1.bf16.msra.mxu0 %v1271_v13 }
  0x52   :  { %307 = vmatprep.subr.bf16.mxu0 %v1272_v14  ;;  %1147 = vmatpush3.bf16.msra.mxu1 %v1285_v21  ;;  %v1293_v21 = vld [vmem:[#allocation7 + $0x18] sm:$0xff]  }
  0x53   :  { %1148 = vmatprep.subr.bf16.mxu1 %v1469_v1 }
  0x55   :  { %308 = vmatpush1.bf16.msra.mxu0 %v1274_v16 }
  0x56   :  { %309 = vmatprep.subr.bf16.mxu0 %v1275_v17  ;;  %1149 = vmatpush3.bf16.msra.mxu1 %v1286_v25  ;;  %v1289_v17 = vld [vmem:[#allocation7 + $0x38] sm:$0xff]  }
  0x57   :  { %1150 = vmatprep.subr.bf16.mxu1 %v1469_v1 }
  0x59   :  { %310 = vmatpush1.bf16.msra.mxu0 %v1277_v19  ;;  %v1291_v19 = vld [vmem:[#allocation7 + $0x28] sm:$0xff]  }
  0x5a   :  { %311 = vmatprep.subr.bf16.mxu0 %v1278_v20  ;;  %1151 = vmatpush3.bf16.msra.mxu1 %v1287_v27  ;;  %v1292_v20 = vld [vmem:[#allocation7 + $0x20] sm:$0xff]  }
  0x5b   :  { %1152 = vmatprep.subr.bf16.mxu1 %v1469_v1 }
  0x5d   :  { %312 = vmatpush1.bf16.msra.mxu0 %v1280_v22 }
  0x5e   :  { %1182 = vmatprep.subr.bf16.mxu0 %v1469_v1  ;;  %1153 = vmatpush3.bf16.msra.mxu1 %v1288_v28 }
  0x5f   :  { %1158 = vmatprep.subr.bf16.mxu1 %v1469_v1 }
  0x60   :  { %330 = vmatmul.mubr.bf16.vlgmr.msra.gmra.mxu0 %v116_v26 }
  0x61   :  { %1198 = vmatprep.mubr.msk.bf16.mxu0 %vm1470_vm0, %v1469_v1  ;;  %1155 = vmatmul.mubr.bf16.vlgmr.msra.gmra.mxu1 %v116_v26 }
  0x62   :  { %1160 = vmatprep.mubr.msk.bf16.mxu1 %vm1470_vm0, %v1469_v1  ;;  %1183 = vmatpush3.bf16.msra.mxu0 %v1289_v17 }
  0x63   :  { %1184 = vmatprep.subr.bf16.mxu0 %v1469_v1 }
  0x66   :  { %1185 = vmatpush3.bf16.msra.mxu0 %v1290_v18 }
  0x67   :  { %1186 = vmatprep.subr.bf16.mxu0 %v1469_v1 }
  0x6a   :  { %1187 = vmatpush3.bf16.msra.mxu0 %v1291_v19 }
  0x6b   :  { %1188 = vmatprep.subr.bf16.mxu0 %v1469_v1 }
  0x6e   :  { %1189 = vmatpush3.bf16.msra.mxu0 %v1292_v20  ;;  %v1072_v20 = vld [vmem:[%s1683_s5] ss:$0 sm:$0xff] }
  0x6f   :  { %1190 = vmatprep.subr.bf16.mxu0 %v1469_v1 }
  0x72   :  { %1191 = vmatpush3.bf16.msra.mxu0 %v1293_v21 }
  0x73   :  { %1192 = vmatprep.subr.bf16.mxu0 %v1469_v1 }
 0x120   :  { %v331_v35 = vpop.f32.mrf.mxu0 }
 0x121   :  { %v332_v42 = vadd.f32 %v331_v35, %v157_v38  ;;  %v374_v50 = vpop.f32.mrf.mxu1  ;;  %v1296_v35 = vld [vmem:[#allocation7] sm:$0xff]  }
 0x122   :  { %v333_v36 = vpop.f32.mrf.mxu0  ;;  %v375_v51 = vadd.f32 %v374_v50, %v165_v49 }
 0x123   :  { %v334_v37 = vadd.f32 %v333_v36, %v161_v33  ;;  %v381_v44 = vpack.c.bf16 %v332_v42, %v332_v42  ;;  %v1156_v52 = vpop.f32.mrf.mxu1 }
 0x124   :  { %v335_v39 = vpop.f32.mrf.mxu0  ;;  %v385_v53 = vpack.c.bf16 %v375_v51, %v375_v51 }
 0x125   :  { %v383_v40 = vpack.c.bf16 %v334_v37, %v334_v37  ;;  %v336_v46 = vadd.f32 %v335_v39, %v157_v38  ;;  %v377_v54 = vpop.f32.mrf.mxu1 }
 0x126   :  { %v337_v41 = vpop.f32.mrf.mxu0  ;;  %v497_v55 = vsel %vm495_vm1, %v385_v53, 0  ;;  %v378_v56 = vadd.f32 %v377_v54, %v165_v49  ;;  %v1297_v54 = vld [vmem:[#allocation8 + $0x38] sm:$0xff]  }
 0x127   :  { %1159 = vmatpush3.bf16.xpose.msra.mxu1 %v383_v40  ;;  %v338_v43 = vadd.f32 %v337_v41, %v161_v33  ;;  %v382_v47 = vpack.c.bf16 %v336_v46, %v336_v46  ;;  %v1157_v57 = vpop.f32.mrf.mxu1  ;;  %v1294_v33 = vld [vmem:[#allocation7 + $0x10] sm:$0xff]  }
 0x128   :  { %1164 = vmatprep.subr.bf16.mxu1 %v1469_v1  ;;  %v386_v58 = vpack.c.bf16 %v378_v56, %v378_v56  ;;  %1193 = vmatpush3.bf16.msra.mxu0 %v1294_v33  ;;  %v1311_v33 = vld [vmem:[#allocation10 + $0x8] sm:$0xff]  }
 0x129   :  { %v384_v45 = vpack.c.bf16 %v338_v43, %v338_v43  ;;  %1194 = vmatprep.subr.bf16.mxu0 %v1469_v1 }
 0x12a   :  { %v543_v59 = vsel %vm495_vm1, %v386_v58, 0 }
 0x12c   :  { %1195 = vmatpush3.bf16.msra.mxu0 %v1295_v34  ;;  %v1312_v34 = vld [vmem:[#allocation10] sm:$0xff]  }
 0x12d   :  { %1196 = vmatprep.subr.bf16.mxu0 %v1469_v1 }
 0x12e   :  { %1161 = vmatmul.mubr.bf16.vlgmr.msra.gmra.mxu1 %v381_v44 }
 0x12f   :  { %1165 = vmatpush3.bf16.xpose.msra.mxu1 %v384_v45  ;;  %1166 = vmatprep.mubr.msk.bf16.mxu1 %vm1470_vm0, %v1469_v1  ;;  %v1063_v45 = vld [vmem:[%s1682_s4] ss:$0 sm:$0xff] }
 0x130   :  { %1170 = vmatprep.subr.bf16.mxu1 %v1469_v1  ;;  %1197 = vmatpush3.bf16.msra.mxu0 %v1296_v35  ;;  %v1074_v35 = vld [vmem:[%s1686_s8] ss:$0 sm:$0xff] }
 0x131   :  { %1222 = vmatprep.subr.bf16.mxu0 %v1469_v1 }
 0x136   :  { %1167 = vmatmul.mubr.bf16.vlgmr.msra.gmra.mxu1 %v382_v47 }
 0x137   :  { %1172 = vmatprep.mubr.msk.bf16.mxu1 %vm1470_vm0, %v1469_v1  ;;  %1171 = vmatpush3.bf16.msra.mxu1 %v497_v55  ;;  %v1630_v55 = vand.u32 127, %v117_v29  ;;  %v1298_v29 = vld [vmem:[#allocation8 + $0x30] sm:$0xff]  }
 0x138   :  { %1176 = vmatprep.subr.bf16.mxu1 %v1469_v1 }
 0x139   :  { %vm119_vm3 = vcmp.lt.s32.totalorder %v1630_v55, 32  ;;  %v1093_v55 = vld [vmem:[%s1690_s12] ss:$0 sm:$0xff] }
 0x1ee   :  { %v421_v60 = vpop.f32.mrf.mxu1 }
 0x1ef   :  { %v468_v61 = vsel %vm467_vm2, %v421_v60, -inf }
 0x1f0   :  { %469 = vmax.xlane.f32.xlu0 %v468_v61  ;;  %v1162_v62 = vpop.f32.mrf.mxu1 }
 0x1f2   :  { %v424_v63 = vpop.f32.mrf.mxu1 }
 0x1f4   :  { %v1163_v0 = vpop.f32.mrf.mxu1 }
 0x1f5   :  { %v1299_v0 = vld [vmem:[#allocation8 + $0x28] sm:$0xff]  }
 0x1f6   :  { %v461_v2 = vpop.f32.mrf.mxu1 }
 0x1f7   :  { %v471_v3 = vsel %vm467_vm2, %v461_v2, -inf }
 0x1f8   :  { %472 = vmax.xlane.f32.xlu0 %v471_v3  ;;  %v1168_v4 = vpop.f32.mrf.mxu1  ;;  %v1301_v3 = vld [vmem:[#allocation8 + $0x18] sm:$0xff]  }
 0x1f9   :  { %v1302_v4 = vld [vmem:[#allocation8 + $0x10] sm:$0xff]  }
 0x1fa   :  { %v464_v5 = vpop.f32.mrf.mxu1 }
 0x1fb   :  { %v1303_v5 = vld [vmem:[#allocation8 + $0x8] sm:$0xff]  }
 0x1fc   :  { %v1169_v6 = vpop.f32.mrf.mxu1 }
 0x1fd   :  { %v1304_v6 = vld [vmem:[#allocation8] sm:$0xff]  }
 0x279   :  { %v470_v7 = vpop.xlane.xlu0 %469 }
 0x27a   :  { %v474_v8 = vsub.f32 %v421_v60, %v470_v7  ;;  %v1305_v7 = vld [vmem:[#allocation10 + $0x38] sm:$0xff]  }
 0x27c   :  { %v476_v9 = vmul.f32 1.442695, %v474_v8  ;;  %v1306_v8 = vld [vmem:[#allocation10 + $0x30] sm:$0xff]  }
 0x27e   :  { %1313 = vpow2.f32 %v476_v9  ;;  %v1307_v9 = vld [vmem:[#allocation10 + $0x28] sm:$0xff]  }
 0x281   :  { %v473_v10 = vpop.xlane.xlu0 %472 }
 0x282   :  { %v475_v11 = vsub.f32 %v461_v2, %v473_v10  ;;  %v1300_v2 = vld [vmem:[#allocation8 + $0x20] sm:$0xff]  }
 0x283   :  { %v1308_v10 = vld [vmem:[#allocation10 + $0x20] sm:$0xff]  }
 0x284   :  { %v478_v12 = vmul.f32 1.442695, %v475_v11  ;;  %v1309_v11 = vld [vmem:[#allocation10 + $0x18] sm:$0xff]  }
 0x286   :  { %1315 = vpow2.f32 %v478_v12 }
 0x28b   :  { %v1314_v13 = vpop.eup %1313 }
 0x28c   :  { %v480_v14 = vsel %vm467_vm2, %v1314_v13, 0.0 }
 0x28d   :  { %481 = vadd.xlane.f32.xlu1 %v480_v14 }
 0x293   :  { %v1316_v15 = vpop.eup %1315 }
 0x294   :  { %v483_v16 = vsel %vm467_vm2, %v1316_v15, 0.0 }
 0x295   :  { %484 = vadd.xlane.f32.xlu1 %v483_v16 }
 0x316   :  { %v482_v22 = vpop.xlane.xlu1 %481 }
 0x317   :  { %1317 = vrcp.f32 %v482_v22 }
 0x31e   :  { %v485_v25 = vpop.xlane.xlu1 %484 }
 0x31f   :  { %1319 = vrcp.f32 %v485_v25 }
 0x324   :  { %v1318_v26 = vpop.eup %1317 }
 0x325   :  { %v488_v27 = vmul.f32 %v1318_v26, %v1314_v13  ;;  %v1073_v26 = vld [vmem:[%s1684_s6] ss:$0 sm:$0xff] }
 0x327   :  { %v490_v28 = vpack.c.bf16 %v488_v27, %v488_v27 }
 0x329   :  { %1173 = vmatmul.mubr.msk.bf16.vlgmr.msra.gmra.mxu1 %vm467_vm2, %v490_v28 }
 0x32a   :  { %1177 = vmatpush3.bf16.msra.mxu1 %v543_v59  ;;  %1178 = vmatprep.mubr.msk.bf16.mxu1 %vm1470_vm0, %v1469_v1 }
 0x32b   :  { %1202 = vmatprep.subr.bf16.mxu1 %v1469_v1 }
 0x32c   :  { %v1320_v30 = vpop.eup %1319 }
 0x32d   :  { %v489_v31 = vmul.f32 %v1320_v30, %v1316_v15 }
 0x32f   :  { %v491_v32 = vpack.c.bf16 %v489_v31, %v489_v31 }
 0x331   :  { %1179 = vmatmul.mubr.msk.bf16.vlgmr.msra.gmra.mxu1 %vm467_vm2, %v491_v32  ;;  %v1310_v32 = vld [vmem:[#allocation10 + $0x10] sm:$0xff]  }
 0x332   :  { %1218 = vmatprep.mubr.msk.bf16.mxu1 %vm1470_vm0, %v1469_v1  ;;  %1203 = vmatpush3.bf16.msra.mxu1 %v1297_v54 }
 0x333   :  { %1204 = vmatprep.subr.bf16.mxu1 %v1469_v1 }
 0x336   :  { %1205 = vmatpush3.bf16.msra.mxu1 %v1298_v29 }
 0x337   :  { %1206 = vmatprep.subr.bf16.mxu1 %v1469_v1 }
 0x33a   :  { %1207 = vmatpush3.bf16.msra.mxu1 %v1299_v0 }
 0x33b   :  { %1208 = vmatprep.subr.bf16.mxu1 %v1469_v1 }
 0x33e   :  { %1209 = vmatpush3.bf16.msra.mxu1 %v1300_v2 }
 0x33f   :  { %1210 = vmatprep.subr.bf16.mxu1 %v1469_v1 }
 0x342   :  { %1211 = vmatpush3.bf16.msra.mxu1 %v1301_v3 }
 0x343   :  { %1212 = vmatprep.subr.bf16.mxu1 %v1469_v1 }
 0x346   :  { %1213 = vmatpush3.bf16.msra.mxu1 %v1302_v4 }
 0x347   :  { %1214 = vmatprep.subr.bf16.mxu1 %v1469_v1 }
 0x34a   :  { %1215 = vmatpush3.bf16.msra.mxu1 %v1303_v5  ;;  %v1092_v5 = vld [vmem:[%s1689_s11] ss:$0 sm:$0xff] }
 0x34b   :  { %1216 = vmatprep.subr.bf16.mxu1 %v1469_v1 }
 0x34e   :  { %1217 = vmatpush3.bf16.msra.mxu1 %v1304_v6 }
 0x3e9   :  { %v533_v36 = vpop.f32.mrf.mxu1 }
 0x3eb   :  { %v1174_v37 = vpop.f32.mrf.mxu1 }
 0x3ed   :  { %v536_v38 = vpop.f32.mrf.mxu1 }
 0x3ef   :  { %v1175_v39 = vpop.f32.mrf.mxu1 }
 0x3f1   :  { %v579_v40 = vpop.f32.mrf.mxu1 }
 0x3f2   :  { %v585_v41 = vpack.c.bf16 %v579_v40, %v533_v36 }
 0x3f3   :  { %v1180_v42 = vpop.f32.mrf.mxu1 }
 0x3f4   :  { %1199 = vmatmul.mubr.bf16.vlgmr.msra.gmra.mxu0 %v585_v41 }
 0x3f5   :  { %v582_v43 = vpop.f32.mrf.mxu1  ;;  %1238 = vmatprep.mubr.msk.bf16.mxu0 %vm1470_vm0, %v1469_v1  ;;  %1223 = vmatpush3.bf16.msra.mxu0 %v1305_v7 }
 0x3f6   :  { %1224 = vmatprep.subr.bf16.mxu0 %v1469_v1 }
 0x3f7   :  { %v1181_v44 = vpop.f32.mrf.mxu1 }
 0x3f9   :  { %1225 = vmatpush3.bf16.msra.mxu0 %v1306_v8 }
 0x3fa   :  { %1226 = vmatprep.subr.bf16.mxu0 %v1469_v1 }
 0x3fd   :  { %1227 = vmatpush3.bf16.msra.mxu0 %v1307_v9 }
 0x3fe   :  { %1228 = vmatprep.subr.bf16.mxu0 %v1469_v1 }
 0x401   :  { %1229 = vmatpush3.bf16.msra.mxu0 %v1308_v10 }
 0x402   :  { %1230 = vmatprep.subr.bf16.mxu0 %v1469_v1 }
 0x405   :  { %1231 = vmatpush3.bf16.msra.mxu0 %v1309_v11 }
 0x406   :  { %1232 = vmatprep.subr.bf16.mxu0 %v1469_v1 }
 0x409   :  { %1233 = vmatpush3.bf16.msra.mxu0 %v1310_v32 }
 0x40a   :  { %1234 = vmatprep.subr.bf16.mxu0 %v1469_v1 }
 0x40d   :  { %1235 = vmatpush3.bf16.msra.mxu0 %v1311_v33 }
 0x40e   :  { %1236 = vmatprep.subr.bf16.mxu0 %v1469_v1  ;;  %v1083_v1 = vld [vmem:[%s1688_s10] ss:$0 sm:$0xff] }
 0x411   :  { %1237 = vmatpush3.bf16.msra.mxu0 %v1312_v34 }
 0x4b4   :  { %v691_v46 = vpop.f32.mrf.mxu0 }
 0x4b5   :  { %v692_v47 = vadd.f32 %v1063_v45, %v691_v46 }
 0x4b6   :  { %v1200_v48 = vpop.f32.mrf.mxu0 }
 0x4b7   :  { %v698_v49 = vadd.f32 %v692_v47, %v1573_v23 }
 0x4b8   :  { %v694_v50 = vpop.f32.mrf.mxu0 }
 0x4b9   :  { %v695_v51 = vadd.f32 %v1063_v45, %v694_v50  ;;  %702 = vadd.xlane.f32.xlu0 %v698_v49 }
 0x4ba   :  { %v1201_v52 = vpop.f32.mrf.mxu0 }
 0x4bb   :  { %v699_v53 = vadd.f32 %v695_v51, %v1575_v24 }
 0x4bd   :  { %704 = vadd.xlane.f32.xlu1 %v699_v53 }
 0x542   :  { %v703_v56 = vpop.xlane.xlu0 %702 }
 0x543   :  { %v706_v57 = vmul.f32 0.03125, %v703_v56 }
 0x545   :  { %v708_v58 = vsub.f32 %v698_v49, %v706_v57 }
 0x546   :  { %v705_v23 = vpop.xlane.xlu1 %704 }
 0x547   :  { %v707_v59 = vmul.f32 0.03125, %v705_v23  ;;  %v712_v60 = vsel %vm119_vm3, %v708_v58, 0.0 }
 0x548   :  { %v714_v61 = vmul.f32 %v712_v60, %v712_v60 }
 0x549   :  { %v709_v24 = vsub.f32 %v699_v53, %v707_v59 }
 0x54a   :  { %716 = vadd.xlane.f32.xlu0 %v714_v61 }
 0x54b   :  { %v713_v62 = vsel %vm119_vm3, %v709_v24, 0.0 }
 0x54c   :  { %v715_v63 = vmul.f32 %v713_v62, %v713_v62 }
 0x54e   :  { %718 = vadd.xlane.f32.xlu1 %v715_v63 }
 0x5d3   :  { %v717_v12 = vpop.xlane.xlu0 %716 }
 0x5d4   :  { %v720_v13 = vmul.f32 0.03125, %v717_v12 }
 0x5d6   :  { %v722_v14 = vadd.f32 1e-05, %v720_v13 }
 0x5d7   :  { %v719_v15 = vpop.xlane.xlu1 %718 }
 0x5d8   :  { %1321 = vrsqrt.f32 %v722_v14  ;;  %v721_v16 = vmul.f32 0.03125, %v719_v15 }
 0x5da   :  { %v723_v17 = vadd.f32 1e-05, %v721_v16 }
 0x5dc   :  { %1323 = vrsqrt.f32 %v723_v17 }
 0x5e5   :  { %v1322_v18 = vpop.eup %1321 }
 0x5e6   :  { %v726_v19 = vmul.f32 %v1322_v18, %v712_v60 }
 0x5e8   :  { %v734_v25 = vmul.f32 %v1072_v20, %v726_v19 }
 0x5e9   :  { %v1324_v21 = vpop.eup %1323 }
 0x5ea   :  { %v727_v22 = vmul.f32 %v1324_v21, %v713_v62  ;;  %v742_v28 = vadd.f32 %v1073_v26, %v734_v25 }
 0x5ec   :  { %v735_v27 = vmul.f32 %v1072_v20, %v727_v22 }
 0x5ee   :  { %v743_v30 = vadd.f32 %v1073_v26, %v735_v27 }
 0x5f0   :  { %v744_v31 = vpack.c.bf16 %v743_v30, %v742_v28 }
 0x5f2   :  { %1219 = vmatmul.mubr.bf16.vlgmr.msra.gmra.mxu1 %v744_v31 }
 0x6b2   :  { %v850_v36 = vpop.f32.mrf.mxu1 }
 0x6b3   :  { %v851_v38 = vadd.f32 %v1074_v35, %v850_v36 }
 0x6b4   :  { %v1220_v37 = vpop.f32.mrf.mxu1 }
 0x6b5   :  { %v857_v42 = vmax.f32 %v851_v38, 0.0 }
 0x6b6   :  { %v853_v39 = vpop.f32.mrf.mxu1 }
 0x6b7   :  { %v854_v40 = vadd.f32 %v1074_v35, %v853_v39 }
 0x6b8   :  { %v1221_v41 = vpop.f32.mrf.mxu1 }
 0x6b9   :  { %v858_v43 = vmax.f32 %v854_v40, 0.0 }
 0x6bb   :  { %v859_v44 = vpack.c.bf16 %v858_v43, %v857_v42 }
 0x6bd   :  { %1239 = vmatmul.mubr.bf16.vlgmr.msra.gmra.mxu0 %v859_v44 }
 0x77d   :  { %v965_v45 = vpop.f32.mrf.mxu0 }
 0x77e   :  { %v966_v46 = vadd.f32 %v1083_v1, %v965_v45 }
 0x77f   :  { %v1240_v47 = vpop.f32.mrf.mxu0 }
 0x780   :  { %v972_v48 = vadd.f32 %v966_v46, %v742_v28 }
 0x781   :  { %v968_v49 = vpop.f32.mrf.mxu0 }
 0x782   :  { %v969_v50 = vadd.f32 %v1083_v1, %v968_v49  ;;  %976 = vadd.xlane.f32.xlu0 %v972_v48 }
 0x783   :  { %v1241_v51 = vpop.f32.mrf.mxu0 }
 0x784   :  { %v973_v52 = vadd.f32 %v969_v50, %v743_v30 }
 0x786   :  { %978 = vadd.xlane.f32.xlu1 %v973_v52 }
 0x80b   :  { %v977_v53 = vpop.xlane.xlu0 %976 }
 0x80c   :  { %v980_v54 = vmul.f32 0.03125, %v977_v53 }
 0x80e   :  { %v982_v56 = vsub.f32 %v972_v48, %v980_v54 }
 0x80f   :  { %v979_v57 = vpop.xlane.xlu1 %978 }
 0x810   :  { %v981_v58 = vmul.f32 0.03125, %v979_v57  ;;  %v984_v23 = vsel %vm119_vm3, %v982_v56, 0.0 }
 0x811   :  { %v986_v59 = vmul.f32 %v984_v23, %v984_v23 }
 0x812   :  { %v983_v60 = vsub.f32 %v973_v52, %v981_v58 }
 0x813   :  { %988 = vadd.xlane.f32.xlu0 %v986_v59 }
 0x814   :  { %v985_v61 = vsel %vm119_vm3, %v983_v60, 0.0 }
 0x815   :  { %v987_v24 = vmul.f32 %v985_v61, %v985_v61 }
 0x817   :  { %990 = vadd.xlane.f32.xlu1 %v987_v24 }
 0x89c   :  { %v989_v62 = vpop.xlane.xlu0 %988 }
 0x89d   :  { %v992_v63 = vmul.f32 0.03125, %v989_v62 }
 0x89f   :  { %v994_v29 = vadd.f32 1e-05, %v992_v63 }
 0x8a0   :  { %v991_v0 = vpop.xlane.xlu1 %990 }
 0x8a1   :  { %1325 = vrsqrt.f32 %v994_v29  ;;  %v993_v2 = vmul.f32 0.03125, %v991_v0 }
 0x8a3   :  { %v995_v3 = vadd.f32 1e-05, %v993_v2 }
 0x8a5   :  { %1327 = vrsqrt.f32 %v995_v3 }
 0x8ae   :  { %v1326_v4 = vpop.eup %1325 }
 0x8af   :  { %v998_v6 = vmul.f32 %v1326_v4, %v984_v23 }
 0x8b1   :  { %v1006_v7 = vmul.f32 %v1092_v5, %v998_v6 }
 0x8b2   :  { %v1328_v8 = vpop.eup %1327 }
 0x8b3   :  { %v999_v9 = vmul.f32 %v1328_v8, %v985_v61  ;;  %v1014_v10 = vadd.f32 %v1093_v55, %v1006_v7 }
 0x8b5   :  { %v1007_v11 = vmul.f32 %v1092_v5, %v999_v9  ;;  %1016 = vst [vmem:[#allocation11] sm:$0xff] %v1014_v10 }
 0x8b7   :  { %v1015_v12 = vadd.f32 %v1093_v55, %v1007_v11 }
 0x8b9   :  { %1017 = vst [vmem:[#allocation11 + $0x8] sm:$0xff] %v1015_v12 }
 0x8ba   :  { %1440 = shalt.err (!%p1437_p1)
}
 0x8bb   :  { %1029 = dma.vmem_to_hbm [thread:$0]  %s1024_s29, 256, %s1691_s13, [#allocation4], %s1464_s24, %s1464_s24, %s1465_s25  }
 0x8bc   :  { %1455 = dma.done.wait [#allocation4], 256  }
 0x8bd   :  { %1456 = vsyncadd [#allocation4], 4294967040 }
 0x8be   :  { %1033 = vsyncpa [#allocation3], 1 }
 0x8bf   :  { %1034 = vsyncpa [#allocation6], 1 }
 0x8c0   :  { %1035 = vsyncpa [#allocation9], 1 }
 0x8c1   :  { %1036 = vsyncpa [#allocation4], 1 }

</bundles_post_ra>
